<compile_context>
chip_gen: v5e
topology: v5e:2x2
jax: 0.10.0
libtpu: 0.0.40
codegen_flags: <defaults>
</compile_context>

<pallas_src>
import math

import jax
import jax.numpy as jnp
import numpy as np
from jax.experimental import pallas as pl
from jax.experimental.pallas import tpu as pltpu

PADDING_IDX = 1


# ----------------------------------------------------------------------------
# Kernel 1: embedding lookup via scalar-prefetch DMA row gather
# ----------------------------------------------------------------------------
def _embed_gather_kernel(ids_ref, w_hbm, o_ref, sem):
    # ids_ref : (N,)   int32   scalar-prefetched flat token ids (SMEM)
    # w_hbm   : (V, D) float32 embedding table, left resident in HBM (pl.ANY)
    # o_ref   : (TN, D) float32 output block for this grid step (VMEM)
    # sem     : (TN,)  DMA semaphores
    i = pl.program_id(0)
    tn = o_ref.shape[0]
    n_tokens = ids_ref.shape[0]
    vocab = w_hbm.shape[0]
    base = i * tn

    # Issue all row DMAs for this tile first (they run concurrently), then wait.
    for t in range(tn):
        @pl.when(base + t < n_tokens)
        def _start(t=t):
            # Clamp for safety: PyTorch would raise on out-of-range ids; an
            # unguarded OOB DMA would hard-fault the chip.
            row = ids_ref[base + t]
            row = jnp.minimum(jnp.maximum(row, 0), vocab - 1)
            pltpu.make_async_copy(w_hbm.at[row], o_ref.at[t], sem.at[t]).start()

    for t in range(tn):
        @pl.when(base + t < n_tokens)
        def _wait(t=t):
            pltpu.make_async_copy(w_hbm.at[0], o_ref.at[t], sem.at[t]).wait()


def embed_lookup(ids, weight, *, tn=32):
    """ids: int array of any shape, weight: (V, D) -> ids.shape + (D,)."""
    ids_shape = ids.shape
    V, D = weight.shape
    N = math.prod(ids_shape)
    flat_ids = ids.reshape(N).astype(jnp.int32)

    # Tokens per grid step: multiple of 8, no larger than needed for small N.
    tn = max(8, min(tn, ((N + 7) // 8) * 8))
    grid = (pl.cdiv(N, tn),)

    out = pl.pallas_call(
        _embed_gather_kernel,
        out_shape=jax.ShapeDtypeStruct((N, D), weight.dtype),
        grid_spec=pltpu.PrefetchScalarGridSpec(
            num_scalar_prefetch=1,                      # flat_ids -> SMEM
            grid=grid,
            in_specs=[
                pl.BlockSpec(memory_space=pl.ANY),      # weight stays in HBM
            ],
            out_specs=pl.BlockSpec((tn, D), lambda i, ids: (i, 0)),
            scratch_shapes=[pltpu.SemaphoreType.DMA((tn,))],
        ),
        compiler_params=pltpu.CompilerParams(
            dimension_semantics=("parallel",),
        ),
    )(flat_ids, weight)
    return out.reshape(*ids_shape, D)


# ----------------------------------------------------------------------------
# Kernel 2: tf-idf path -> tiled dense matmul x @ W with f32 accumulator
# ----------------------------------------------------------------------------
def _tfidf_matmul_kernel(x_ref, w_ref, o_ref, acc_ref):
    @pl.when(pl.program_id(2) == 0)
    def _():
        acc_ref[...] = jnp.zeros_like(acc_ref)

    acc_ref[...] += jnp.dot(
        x_ref[...], w_ref[...], preferred_element_type=jnp.float32
    )

    @pl.when(pl.program_id(2) == pl.num_programs(2) - 1)
    def _():
        o_ref[...] = acc_ref[...].astype(o_ref.dtype)


def tfidf_embed(x, weight, *, tb=256, td=256, tk=512):
    """x: (B, V) float32, weight: (V, D) float32 -> (B, D) float32."""
    B, V = x.shape
    _, D = weight.shape
    x = x.astype(jnp.float32)
    weight = weight.astype(jnp.float32)

    tb = min(tb, B)
    td = min(td, D)
    tk = min(tk, V)
    # Zero-pad the contraction dim so every K tile is fully valid (partial
    # input blocks along the reduction axis would otherwise accumulate garbage).
    kpad = (-V) % tk
    if kpad:
        x = jnp.pad(x, ((0, 0), (0, kpad)))
        weight = jnp.pad(weight, ((0, kpad), (0, 0)))
    Vp = V + kpad

    grid = (pl.cdiv(B, tb), pl.cdiv(D, td), Vp // tk)
    return pl.pallas_call(
        _tfidf_matmul_kernel,
        out_shape=jax.ShapeDtypeStruct((B, D), jnp.float32),
        grid_spec=pltpu.PrefetchScalarGridSpec(
            num_scalar_prefetch=0,
            grid=grid,
            in_specs=[
                pl.BlockSpec((tb, tk), lambda i, j, k: (i, k)),
                pl.BlockSpec((tk, td), lambda i, j, k: (k, j)),
            ],
            out_specs=pl.BlockSpec((tb, td), lambda i, j, k: (i, j)),
            scratch_shapes=[pltpu.VMEM((tb, td), jnp.float32)],
        ),
        compiler_params=pltpu.CompilerParams(
            dimension_semantics=("parallel", "parallel", "arbitrary"),
        ),
    )(x, weight)


# ----------------------------------------------------------------------------
# Module wrapper (mirrors the PyTorch Embedder forward semantics)
# ----------------------------------------------------------------------------
class Embedder:
    def __init__(self, vocab_size, embedding_dim, pretrain_matrix=None,
                 freeze=False, use_tfidf=False, key=None):
        self.use_tfidf = use_tfidf
        if pretrain_matrix is not None:
            self.weight = jnp.asarray(pretrain_matrix, jnp.float32)
        else:
            key = key if key is not None else jax.random.PRNGKey(0)
            w = jax.random.normal(key, (vocab_size, embedding_dim), jnp.float32)
            # nn.Embedding(padding_idx=1) zero-initializes the padding row
            w = w.at[PADDING_IDX].set(0.0)
            self.weight = w
        # TODO(synk): `freeze` only affects gradients during training; the
        # forward pass implemented here is identical either way.

    def __call__(self, x):
        if self.use_tfidf:
            return tfidf_embed(x.astype(jnp.float32), self.weight)
        return embed_lookup(x.astype(jnp.int32), self.weight)


if __name__ == "__main__":
    key = jax.random.PRNGKey(0)
    k_w, k_ids, k_tfidf = jax.random.split(key, 3)

    VOCAB, DIM = 50, 32
    B, S = 2, 8

    # --- lookup path ---
    emb = Embedder(VOCAB, DIM, use_tfidf=False, key=k_w)
    ids = jax.random.randint(k_ids, (B, S), 0, VOCAB, dtype=jnp.int32)
    out_lookup = jax.block_until_ready(emb(ids))
    ref_lookup = emb.weight[ids]
    np.testing.assert_allclose(np.asarray(out_lookup), np.asarray(ref_lookup),
                               rtol=1e-6, atol=1e-6)

    # --- tf-idf path ---
    emb_tfidf = Embedder(VOCAB, DIM, use_tfidf=True, key=k_w)
    x_tfidf = jax.random.uniform(k_tfidf, (B, VOCAB), jnp.float32)
    out_tfidf = jax.block_until_ready(emb_tfidf(x_tfidf))
    ref_tfidf = x_tfidf @ emb_tfidf.weight
    np.testing.assert_allclose(np.asarray(out_tfidf), np.asarray(ref_tfidf),
                               rtol=1e-5, atol=1e-5)

    print("KERNEL_OK")
</pallas_src>

<mosaic_0001>
module attributes {stable_mosaic.version = 11 : i64} {
  func.func @_embed_gather_kernel(%arg0: i32, %arg1: memref<16xi32, #tpu.memory_space<smem>>, %arg2: memref<50x32xf32, #tpu.memory_space<any>>, %arg3: memref<16x32xf32, #tpu.memory_space<vmem>>, %arg4: memref<16x!tpu.dma_semaphore, #tpu.memory_space<semaphore_mem>>) attributes {dimension_semantics = [#tpu.dimension_semantics<parallel>], iteration_bounds = array<i64: 1>, scalar_prefetch = 1 : i64, scratch_operands = 1 : i64, tpu.core_type = #tpu.core_type<tc>, window_params = [{}, {transform_indices = @transform_1, window_bounds = array<i64: 16, 32>}]} {
    %c16_i32 = arith.constant 16 : i32
    %0 = arith.muli %arg0, %c16_i32 : i32
    %c0_i32 = arith.constant 0 : i32
    %1 = arith.addi %0, %c0_i32 : i32
    %c16_i32_0 = arith.constant 16 : i32
    %2 = arith.cmpi slt, %1, %c16_i32_0 : i32
    %3 = arith.extui %2 : i1 to i32
    %c0_i32_1 = arith.constant 0 : i32
    %4 = arith.cmpi ne, %3, %c0_i32_1 : i32
    scf.if %4 {
      %c0_i32_80 = arith.constant 0 : i32
      %129 = arith.addi %0, %c0_i32_80 : i32
      %130 = arith.index_cast %129 : i32 to index
      %131 = memref.load %arg1[%130] : memref<16xi32, #tpu.memory_space<smem>>
      %c0_i32_81 = arith.constant 0 : i32
      %132 = arith.maxsi %131, %c0_i32_81 : i32
      %c49_i32 = arith.constant 49 : i32
      %133 = arith.minsi %132, %c49_i32 : i32
      %c0_i32_82 = arith.constant 0 : i32
      %c0_i32_83 = arith.constant 0 : i32
      %c0_i32_84 = arith.constant 0 : i32
      %134 = tpu.memref_slice %arg2[%133, %c0_i32_84] : memref<50x32xf32, #tpu.memory_space<any>> -> memref<1x32xf32, #tpu.memory_space<any>>
      %135 = tpu.memref_squeeze %134 : memref<1x32xf32, #tpu.memory_space<any>> -> memref<32xf32, #tpu.memory_space<any>>
      %c0_i32_85 = arith.constant 0 : i32
      %136 = tpu.memref_slice %arg3[%c0_i32_82, %c0_i32_85] : memref<16x32xf32, #tpu.memory_space<vmem>> -> memref<1x32xf32, #tpu.memory_space<vmem>>
      %137 = tpu.memref_squeeze %136 : memref<1x32xf32, #tpu.memory_space<vmem>> -> memref<32xf32, #tpu.memory_space<vmem>>
      %138 = tpu.memref_slice %arg4[%c0_i32_83] : memref<16x!tpu.dma_semaphore, #tpu.memory_space<semaphore_mem>> -> memref<1x!tpu.dma_semaphore, #tpu.memory_space<semaphore_mem>>
      %139 = tpu.memref_squeeze %138 : memref<1x!tpu.dma_semaphore, #tpu.memory_space<semaphore_mem>> -> memref<!tpu.dma_semaphore, #tpu.memory_space<semaphore_mem>>
      tpu.enqueue_dma source(%135 : memref<32xf32, #tpu.memory_space<any>>) target(%137 : memref<32xf32, #tpu.memory_space<vmem>>) target_semaphore(%139 : memref<!tpu.dma_semaphore, #tpu.memory_space<semaphore_mem>>)
    } else {
    }
    %c1_i32 = arith.constant 1 : i32
    %5 = arith.addi %0, %c1_i32 : i32
    %c16_i32_2 = arith.constant 16 : i32
    %6 = arith.cmpi slt, %5, %c16_i32_2 : i32
    %7 = arith.extui %6 : i1 to i32
    %c0_i32_3 = arith.constant 0 : i32
    %8 = arith.cmpi ne, %7, %c0_i32_3 : i32
    scf.if %8 {
      %c1_i32_80 = arith.constant 1 : i32
      %129 = arith.addi %0, %c1_i32_80 : i32
      %130 = arith.index_cast %129 : i32 to index
      %131 = memref.load %arg1[%130] : memref<16xi32, #tpu.memory_space<smem>>
      %c0_i32_81 = arith.constant 0 : i32
      %132 = arith.maxsi %131, %c0_i32_81 : i32
      %c49_i32 = arith.constant 49 : i32
      %133 = arith.minsi %132, %c49_i32 : i32
      %c1_i32_82 = arith.constant 1 : i32
      %c1_i32_83 = arith.constant 1 : i32
      %c0_i32_84 = arith.constant 0 : i32
      %134 = tpu.memref_slice %arg2[%133, %c0_i32_84] : memref<50x32xf32, #tpu.memory_space<any>> -> memref<1x32xf32, #tpu.memory_space<any>>
      %135 = tpu.memref_squeeze %134 : memref<1x32xf32, #tpu.memory_space<any>> -> memref<32xf32, #tpu.memory_space<any>>
      %c0_i32_85 = arith.constant 0 : i32
      %136 = tpu.memref_slice %arg3[%c1_i32_82, %c0_i32_85] : memref<16x32xf32, #tpu.memory_space<vmem>> -> memref<1x32xf32, #tpu.memory_space<vmem>>
      %137 = tpu.memref_squeeze %136 : memref<1x32xf32, #tpu.memory_space<vmem>> -> memref<32xf32, #tpu.memory_space<vmem>>
      %138 = tpu.memref_slice %arg4[%c1_i32_83] : memref<16x!tpu.dma_semaphore, #tpu.memory_space<semaphore_mem>> -> memref<1x!tpu.dma_semaphore, #tpu.memory_space<semaphore_mem>>
      %139 = tpu.memref_squeeze %138 : memref<1x!tpu.dma_semaphore, #tpu.memory_space<semaphore_mem>> -> memref<!tpu.dma_semaphore, #tpu.memory_space<semaphore_mem>>
      tpu.enqueue_dma source(%135 : memref<32xf32, #tpu.memory_space<any>>) target(%137 : memref<32xf32, #tpu.memory_space<vmem>>) target_semaphore(%139 : memref<!tpu.dma_semaphore, #tpu.memory_space<semaphore_mem>>)
    } else {
    }
    %c2_i32 = arith.constant 2 : i32
    %9 = arith.addi %0, %c2_i32 : i32
    %c16_i32_4 = arith.constant 16 : i32
    %10 = arith.cmpi slt, %9, %c16_i32_4 : i32
    %11 = arith.extui %10 : i1 to i32
    %c0_i32_5 = arith.constant 0 : i32
    %12 = arith.cmpi ne, %11, %c0_i32_5 : i32
    scf.if %12 {
      %c2_i32_80 = arith.constant 2 : i32
      %129 = arith.addi %0, %c2_i32_80 : i32
      %130 = arith.index_cast %129 : i32 to index
      %131 = memref.load %arg1[%130] : memref<16xi32, #tpu.memory_space<smem>>
      %c0_i32_81 = arith.constant 0 : i32
      %132 = arith.maxsi %131, %c0_i32_81 : i32
      %c49_i32 = arith.constant 49 : i32
      %133 = arith.minsi %132, %c49_i32 : i32
      %c2_i32_82 = arith.constant 2 : i32
      %c2_i32_83 = arith.constant 2 : i32
      %c0_i32_84 = arith.constant 0 : i32
      %134 = tpu.memref_slice %arg2[%133, %c0_i32_84] : memref<50x32xf32, #tpu.memory_space<any>> -> memref<1x32xf32, #tpu.memory_space<any>>
      %135 = tpu.memref_squeeze %134 : memref<1x32xf32, #tpu.memory_space<any>> -> memref<32xf32, #tpu.memory_space<any>>
      %c0_i32_85 = arith.constant 0 : i32
      %136 = tpu.memref_slice %arg3[%c2_i32_82, %c0_i32_85] : memref<16x32xf32, #tpu.memory_space<vmem>> -> memref<1x32xf32, #tpu.memory_space<vmem>>
      %137 = tpu.memref_squeeze %136 : memref<1x32xf32, #tpu.memory_space<vmem>> -> memref<32xf32, #tpu.memory_space<vmem>>
      %138 = tpu.memref_slice %arg4[%c2_i32_83] : memref<16x!tpu.dma_semaphore, #tpu.memory_space<semaphore_mem>> -> memref<1x!tpu.dma_semaphore, #tpu.memory_space<semaphore_mem>>
      %139 = tpu.memref_squeeze %138 : memref<1x!tpu.dma_semaphore, #tpu.memory_space<semaphore_mem>> -> memref<!tpu.dma_semaphore, #tpu.memory_space<semaphore_mem>>
      tpu.enqueue_dma source(%135 : memref<32xf32, #tpu.memory_space<any>>) target(%137 : memref<32xf32, #tpu.memory_space<vmem>>) target_semaphore(%139 : memref<!tpu.dma_semaphore, #tpu.memory_space<semaphore_mem>>)
    } else {
    }
    %c3_i32 = arith.constant 3 : i32
    %13 = arith.addi %0, %c3_i32 : i32
    %c16_i32_6 = arith.constant 16 : i32
    %14 = arith.cmpi slt, %13, %c16_i32_6 : i32
    %15 = arith.extui %14 : i1 to i32
    %c0_i32_7 = arith.constant 0 : i32
    %16 = arith.cmpi ne, %15, %c0_i32_7 : i32
    scf.if %16 {
      %c3_i32_80 = arith.constant 3 : i32
      %129 = arith.addi %0, %c3_i32_80 : i32
      %130 = arith.index_cast %129 : i32 to index
      %131 = memref.load %arg1[%130] : memref<16xi32, #tpu.memory_space<smem>>
      %c0_i32_81 = arith.constant 0 : i32
      %132 = arith.maxsi %131, %c0_i32_81 : i32
      %c49_i32 = arith.constant 49 : i32
      %133 = arith.minsi %132, %c49_i32 : i32
      %c3_i32_82 = arith.constant 3 : i32
      %c3_i32_83 = arith.constant 3 : i32
      %c0_i32_84 = arith.constant 0 : i32
      %134 = tpu.memref_slice %arg2[%133, %c0_i32_84] : memref<50x32xf32, #tpu.memory_space<any>> -> memref<1x32xf32, #tpu.memory_space<any>>
      %135 = tpu.memref_squeeze %134 : memref<1x32xf32, #tpu.memory_space<any>> -> memref<32xf32, #tpu.memory_space<any>>
      %c0_i32_85 = arith.constant 0 : i32
      %136 = tpu.memref_slice %arg3[%c3_i32_82, %c0_i32_85] : memref<16x32xf32, #tpu.memory_space<vmem>> -> memref<1x32xf32, #tpu.memory_space<vmem>>
      %137 = tpu.memref_squeeze %136 : memref<1x32xf32, #tpu.memory_space<vmem>> -> memref<32xf32, #tpu.memory_space<vmem>>
      %138 = tpu.memref_slice %arg4[%c3_i32_83] : memref<16x!tpu.dma_semaphore, #tpu.memory_space<semaphore_mem>> -> memref<1x!tpu.dma_semaphore, #tpu.memory_space<semaphore_mem>>
      %139 = tpu.memref_squeeze %138 : memref<1x!tpu.dma_semaphore, #tpu.memory_space<semaphore_mem>> -> memref<!tpu.dma_semaphore, #tpu.memory_space<semaphore_mem>>
      tpu.enqueue_dma source(%135 : memref<32xf32, #tpu.memory_space<any>>) target(%137 : memref<32xf32, #tpu.memory_space<vmem>>) target_semaphore(%139 : memref<!tpu.dma_semaphore, #tpu.memory_space<semaphore_mem>>)
    } else {
    }
    %c4_i32 = arith.constant 4 : i32
    %17 = arith.addi %0, %c4_i32 : i32
    %c16_i32_8 = arith.constant 16 : i32
    %18 = arith.cmpi slt, %17, %c16_i32_8 : i32
    %19 = arith.extui %18 : i1 to i32
    %c0_i32_9 = arith.constant 0 : i32
    %20 = arith.cmpi ne, %19, %c0_i32_9 : i32
    scf.if %20 {
      %c4_i32_80 = arith.constant 4 : i32
      %129 = arith.addi %0, %c4_i32_80 : i32
      %130 = arith.index_cast %129 : i32 to index
      %131 = memref.load %arg1[%130] : memref<16xi32, #tpu.memory_space<smem>>
      %c0_i32_81 = arith.constant 0 : i32
      %132 = arith.maxsi %131, %c0_i32_81 : i32
      %c49_i32 = arith.constant 49 : i32
      %133 = arith.minsi %132, %c49_i32 : i32
      %c4_i32_82 = arith.constant 4 : i32
      %c4_i32_83 = arith.constant 4 : i32
      %c0_i32_84 = arith.constant 0 : i32
      %134 = tpu.memref_slice %arg2[%133, %c0_i32_84] : memref<50x32xf32, #tpu.memory_space<any>> -> memref<1x32xf32, #tpu.memory_space<any>>
      %135 = tpu.memref_squeeze %134 : memref<1x32xf32, #tpu.memory_space<any>> -> memref<32xf32, #tpu.memory_space<any>>
      %c0_i32_85 = arith.constant 0 : i32
      %136 = tpu.memref_slice %arg3[%c4_i32_82, %c0_i32_85] : memref<16x32xf32, #tpu.memory_space<vmem>> -> memref<1x32xf32, #tpu.memory_space<vmem>>
      %137 = tpu.memref_squeeze %136 : memref<1x32xf32, #tpu.memory_space<vmem>> -> memref<32xf32, #tpu.memory_space<vmem>>
      %138 = tpu.memref_slice %arg4[%c4_i32_83] : memref<16x!tpu.dma_semaphore, #tpu.memory_space<semaphore_mem>> -> memref<1x!tpu.dma_semaphore, #tpu.memory_space<semaphore_mem>>
      %139 = tpu.memref_squeeze %138 : memref<1x!tpu.dma_semaphore, #tpu.memory_space<semaphore_mem>> -> memref<!tpu.dma_semaphore, #tpu.memory_space<semaphore_mem>>
      tpu.enqueue_dma source(%135 : memref<32xf32, #tpu.memory_space<any>>) target(%137 : memref<32xf32, #tpu.memory_space<vmem>>) target_semaphore(%139 : memref<!tpu.dma_semaphore, #tpu.memory_space<semaphore_mem>>)
    } else {
    }
    %c5_i32 = arith.constant 5 : i32
    %21 = arith.addi %0, %c5_i32 : i32
    %c16_i32_10 = arith.constant 16 : i32
    %22 = arith.cmpi slt, %21, %c16_i32_10 : i32
    %23 = arith.extui %22 : i1 to i32
    %c0_i32_11 = arith.constant 0 : i32
    %24 = arith.cmpi ne, %23, %c0_i32_11 : i32
    scf.if %24 {
      %c5_i32_80 = arith.constant 5 : i32
      %129 = arith.addi %0, %c5_i32_80 : i32
      %130 = arith.index_cast %129 : i32 to index
      %131 = memref.load %arg1[%130] : memref<16xi32, #tpu.memory_space<smem>>
      %c0_i32_81 = arith.constant 0 : i32
      %132 = arith.maxsi %131, %c0_i32_81 : i32
      %c49_i32 = arith.constant 49 : i32
      %133 = arith.minsi %132, %c49_i32 : i32
      %c5_i32_82 = arith.constant 5 : i32
      %c5_i32_83 = arith.constant 5 : i32
      %c0_i32_84 = arith.constant 0 : i32
      %134 = tpu.memref_slice %arg2[%133, %c0_i32_84] : memref<50x32xf32, #tpu.memory_space<any>> -> memref<1x32xf32, #tpu.memory_space<any>>
      %135 = tpu.memref_squeeze %134 : memref<1x32xf32, #tpu.memory_space<any>> -> memref<32xf32, #tpu.memory_space<any>>
      %c0_i32_85 = arith.constant 0 : i32
      %136 = tpu.memref_slice %arg3[%c5_i32_82, %c0_i32_85] : memref<16x32xf32, #tpu.memory_space<vmem>> -> memref<1x32xf32, #tpu.memory_space<vmem>>
      %137 = tpu.memref_squeeze %136 : memref<1x32xf32, #tpu.memory_space<vmem>> -> memref<32xf32, #tpu.memory_space<vmem>>
      %138 = tpu.memref_slice %arg4[%c5_i32_83] : memref<16x!tpu.dma_semaphore, #tpu.memory_space<semaphore_mem>> -> memref<1x!tpu.dma_semaphore, #tpu.memory_space<semaphore_mem>>
      %139 = tpu.memref_squeeze %138 : memref<1x!tpu.dma_semaphore, #tpu.memory_space<semaphore_mem>> -> memref<!tpu.dma_semaphore, #tpu.memory_space<semaphore_mem>>
      tpu.enqueue_dma source(%135 : memref<32xf32, #tpu.memory_space<any>>) target(%137 : memref<32xf32, #tpu.memory_space<vmem>>) target_semaphore(%139 : memref<!tpu.dma_semaphore, #tpu.memory_space<semaphore_mem>>)
    } else {
    }
    %c6_i32 = arith.constant 6 : i32
    %25 = arith.addi %0, %c6_i32 : i32
    %c16_i32_12 = arith.constant 16 : i32
    %26 = arith.cmpi slt, %25, %c16_i32_12 : i32
    %27 = arith.extui %26 : i1 to i32
    %c0_i32_13 = arith.constant 0 : i32
    %28 = arith.cmpi ne, %27, %c0_i32_13 : i32
    scf.if %28 {
      %c6_i32_80 = arith.constant 6 : i32
      %129 = arith.addi %0, %c6_i32_80 : i32
      %130 = arith.index_cast %129 : i32 to index
      %131 = memref.load %arg1[%130] : memref<16xi32, #tpu.memory_space<smem>>
      %c0_i32_81 = arith.constant 0 : i32
      %132 = arith.maxsi %131, %c0_i32_81 : i32
      %c49_i32 = arith.constant 49 : i32
      %133 = arith.minsi %132, %c49_i32 : i32
      %c6_i32_82 = arith.constant 6 : i32
      %c6_i32_83 = arith.constant 6 : i32
      %c0_i32_84 = arith.constant 0 : i32
      %134 = tpu.memref_slice %arg2[%133, %c0_i32_84] : memref<50x32xf32, #tpu.memory_space<any>> -> memref<1x32xf32, #tpu.memory_space<any>>
      %135 = tpu.memref_squeeze %134 : memref<1x32xf32, #tpu.memory_space<any>> -> memref<32xf32, #tpu.memory_space<any>>
      %c0_i32_85 = arith.constant 0 : i32
      %136 = tpu.memref_slice %arg3[%c6_i32_82, %c0_i32_85] : memref<16x32xf32, #tpu.memory_space<vmem>> -> memref<1x32xf32, #tpu.memory_space<vmem>>
      %137 = tpu.memref_squeeze %136 : memref<1x32xf32, #tpu.memory_space<vmem>> -> memref<32xf32, #tpu.memory_space<vmem>>
      %138 = tpu.memref_slice %arg4[%c6_i32_83] : memref<16x!tpu.dma_semaphore, #tpu.memory_space<semaphore_mem>> -> memref<1x!tpu.dma_semaphore, #tpu.memory_space<semaphore_mem>>
      %139 = tpu.memref_squeeze %138 : memref<1x!tpu.dma_semaphore, #tpu.memory_space<semaphore_mem>> -> memref<!tpu.dma_semaphore, #tpu.memory_space<semaphore_mem>>
      tpu.enqueue_dma source(%135 : memref<32xf32, #tpu.memory_space<any>>) target(%137 : memref<32xf32, #tpu.memory_space<vmem>>) target_semaphore(%139 : memref<!tpu.dma_semaphore, #tpu.memory_space<semaphore_mem>>)
    } else {
    }
    %c7_i32 = arith.constant 7 : i32
    %29 = arith.addi %0, %c7_i32 : i32
    %c16_i32_14 = arith.constant 16 : i32
    %30 = arith.cmpi slt, %29, %c16_i32_14 : i32
    %31 = arith.extui %30 : i1 to i32
    %c0_i32_15 = arith.constant 0 : i32
    %32 = arith.cmpi ne, %31, %c0_i32_15 : i32
    scf.if %32 {
      %c7_i32_80 = arith.constant 7 : i32
      %129 = arith.addi %0, %c7_i32_80 : i32
      %130 = arith.index_cast %129 : i32 to index
      %131 = memref.load %arg1[%130] : memref<16xi32, #tpu.memory_space<smem>>
      %c0_i32_81 = arith.constant 0 : i32
      %132 = arith.maxsi %131, %c0_i32_81 : i32
      %c49_i32 = arith.constant 49 : i32
      %133 = arith.minsi %132, %c49_i32 : i32
      %c7_i32_82 = arith.constant 7 : i32
      %c7_i32_83 = arith.constant 7 : i32
      %c0_i32_84 = arith.constant 0 : i32
      %134 = tpu.memref_slice %arg2[%133, %c0_i32_84] : memref<50x32xf32, #tpu.memory_space<any>> -> memref<1x32xf32, #tpu.memory_space<any>>
      %135 = tpu.memref_squeeze %134 : memref<1x32xf32, #tpu.memory_space<any>> -> memref<32xf32, #tpu.memory_space<any>>
      %c0_i32_85 = arith.constant 0 : i32
      %136 = tpu.memref_slice %arg3[%c7_i32_82, %c0_i32_85] : memref<16x32xf32, #tpu.memory_space<vmem>> -> memref<1x32xf32, #tpu.memory_space<vmem>>
      %137 = tpu.memref_squeeze %136 : memref<1x32xf32, #tpu.memory_space<vmem>> -> memref<32xf32, #tpu.memory_space<vmem>>
      %138 = tpu.memref_slice %arg4[%c7_i32_83] : memref<16x!tpu.dma_semaphore, #tpu.memory_space<semaphore_mem>> -> memref<1x!tpu.dma_semaphore, #tpu.memory_space<semaphore_mem>>
      %139 = tpu.memref_squeeze %138 : memref<1x!tpu.dma_semaphore, #tpu.memory_space<semaphore_mem>> -> memref<!tpu.dma_semaphore, #tpu.memory_space<semaphore_mem>>
      tpu.enqueue_dma source(%135 : memref<32xf32, #tpu.memory_space<any>>) target(%137 : memref<32xf32, #tpu.memory_space<vmem>>) target_semaphore(%139 : memref<!tpu.dma_semaphore, #tpu.memory_space<semaphore_mem>>)
    } else {
    }
    %c8_i32 = arith.constant 8 : i32
    %33 = arith.addi %0, %c8_i32 : i32
    %c16_i32_16 = arith.constant 16 : i32
    %34 = arith.cmpi slt, %33, %c16_i32_16 : i32
    %35 = arith.extui %34 : i1 to i32
    %c0_i32_17 = arith.constant 0 : i32
    %36 = arith.cmpi ne, %35, %c0_i32_17 : i32
    scf.if %36 {
      %c8_i32_80 = arith.constant 8 : i32
      %129 = arith.addi %0, %c8_i32_80 : i32
      %130 = arith.index_cast %129 : i32 to index
      %131 = memref.load %arg1[%130] : memref<16xi32, #tpu.memory_space<smem>>
      %c0_i32_81 = arith.constant 0 : i32
      %132 = arith.maxsi %131, %c0_i32_81 : i32
      %c49_i32 = arith.constant 49 : i32
      %133 = arith.minsi %132, %c49_i32 : i32
      %c8_i32_82 = arith.constant 8 : i32
      %c8_i32_83 = arith.constant 8 : i32
      %c0_i32_84 = arith.constant 0 : i32
      %134 = tpu.memref_slice %arg2[%133, %c0_i32_84] : memref<50x32xf32, #tpu.memory_space<any>> -> memref<1x32xf32, #tpu.memory_space<any>>
      %135 = tpu.memref_squeeze %134 : memref<1x32xf32, #tpu.memory_space<any>> -> memref<32xf32, #tpu.memory_space<any>>
      %c0_i32_85 = arith.constant 0 : i32
      %136 = tpu.memref_slice %arg3[%c8_i32_82, %c0_i32_85] : memref<16x32xf32, #tpu.memory_space<vmem>> -> memref<1x32xf32, #tpu.memory_space<vmem>>
      %137 = tpu.memref_squeeze %136 : memref<1x32xf32, #tpu.memory_space<vmem>> -> memref<32xf32, #tpu.memory_space<vmem>>
      %138 = tpu.memref_slice %arg4[%c8_i32_83] : memref<16x!tpu.dma_semaphore, #tpu.memory_space<semaphore_mem>> -> memref<1x!tpu.dma_semaphore, #tpu.memory_space<semaphore_mem>>
      %139 = tpu.memref_squeeze %138 : memref<1x!tpu.dma_semaphore, #tpu.memory_space<semaphore_mem>> -> memref<!tpu.dma_semaphore, #tpu.memory_space<semaphore_mem>>
      tpu.enqueue_dma source(%135 : memref<32xf32, #tpu.memory_space<any>>) target(%137 : memref<32xf32, #tpu.memory_space<vmem>>) target_semaphore(%139 : memref<!tpu.dma_semaphore, #tpu.memory_space<semaphore_mem>>)
    } else {
    }
    %c9_i32 = arith.constant 9 : i32
    %37 = arith.addi %0, %c9_i32 : i32
    %c16_i32_18 = arith.constant 16 : i32
    %38 = arith.cmpi slt, %37, %c16_i32_18 : i32
    %39 = arith.extui %38 : i1 to i32
    %c0_i32_19 = arith.constant 0 : i32
    %40 = arith.cmpi ne, %39, %c0_i32_19 : i32
    scf.if %40 {
      %c9_i32_80 = arith.constant 9 : i32
      %129 = arith.addi %0, %c9_i32_80 : i32
      %130 = arith.index_cast %129 : i32 to index
      %131 = memref.load %arg1[%130] : memref<16xi32, #tpu.memory_space<smem>>
      %c0_i32_81 = arith.constant 0 : i32
      %132 = arith.maxsi %131, %c0_i32_81 : i32
      %c49_i32 = arith.constant 49 : i32
      %133 = arith.minsi %132, %c49_i32 : i32
      %c9_i32_82 = arith.constant 9 : i32
      %c9_i32_83 = arith.constant 9 : i32
      %c0_i32_84 = arith.constant 0 : i32
      %134 = tpu.memref_slice %arg2[%133, %c0_i32_84] : memref<50x32xf32, #tpu.memory_space<any>> -> memref<1x32xf32, #tpu.memory_space<any>>
      %135 = tpu.memref_squeeze %134 : memref<1x32xf32, #tpu.memory_space<any>> -> memref<32xf32, #tpu.memory_space<any>>
      %c0_i32_85 = arith.constant 0 : i32
      %136 = tpu.memref_slice %arg3[%c9_i32_82, %c0_i32_85] : memref<16x32xf32, #tpu.memory_space<vmem>> -> memref<1x32xf32, #tpu.memory_space<vmem>>
      %137 = tpu.memref_squeeze %136 : memref<1x32xf32, #tpu.memory_space<vmem>> -> memref<32xf32, #tpu.memory_space<vmem>>
      %138 = tpu.memref_slice %arg4[%c9_i32_83] : memref<16x!tpu.dma_semaphore, #tpu.memory_space<semaphore_mem>> -> memref<1x!tpu.dma_semaphore, #tpu.memory_space<semaphore_mem>>
      %139 = tpu.memref_squeeze %138 : memref<1x!tpu.dma_semaphore, #tpu.memory_space<semaphore_mem>> -> memref<!tpu.dma_semaphore, #tpu.memory_space<semaphore_mem>>
      tpu.enqueue_dma source(%135 : memref<32xf32, #tpu.memory_space<any>>) target(%137 : memref<32xf32, #tpu.memory_space<vmem>>) target_semaphore(%139 : memref<!tpu.dma_semaphore, #tpu.memory_space<semaphore_mem>>)
    } else {
    }
    %c10_i32 = arith.constant 10 : i32
    %41 = arith.addi %0, %c10_i32 : i32
    %c16_i32_20 = arith.constant 16 : i32
    %42 = arith.cmpi slt, %41, %c16_i32_20 : i32
    %43 = arith.extui %42 : i1 to i32
    %c0_i32_21 = arith.constant 0 : i32
    %44 = arith.cmpi ne, %43, %c0_i32_21 : i32
    scf.if %44 {
      %c10_i32_80 = arith.constant 10 : i32
      %129 = arith.addi %0, %c10_i32_80 : i32
      %130 = arith.index_cast %129 : i32 to index
      %131 = memref.load %arg1[%130] : memref<16xi32, #tpu.memory_space<smem>>
      %c0_i32_81 = arith.constant 0 : i32
      %132 = arith.maxsi %131, %c0_i32_81 : i32
      %c49_i32 = arith.constant 49 : i32
      %133 = arith.minsi %132, %c49_i32 : i32
      %c10_i32_82 = arith.constant 10 : i32
      %c10_i32_83 = arith.constant 10 : i32
      %c0_i32_84 = arith.constant 0 : i32
      %134 = tpu.memref_slice %arg2[%133, %c0_i32_84] : memref<50x32xf32, #tpu.memory_space<any>> -> memref<1x32xf32, #tpu.memory_space<any>>
      %135 = tpu.memref_squeeze %134 : memref<1x32xf32, #tpu.memory_space<any>> -> memref<32xf32, #tpu.memory_space<any>>
      %c0_i32_85 = arith.constant 0 : i32
      %136 = tpu.memref_slice %arg3[%c10_i32_82, %c0_i32_85] : memref<16x32xf32, #tpu.memory_space<vmem>> -> memref<1x32xf32, #tpu.memory_space<vmem>>
      %137 = tpu.memref_squeeze %136 : memref<1x32xf32, #tpu.memory_space<vmem>> -> memref<32xf32, #tpu.memory_space<vmem>>
      %138 = tpu.memref_slice %arg4[%c10_i32_83] : memref<16x!tpu.dma_semaphore, #tpu.memory_space<semaphore_mem>> -> memref<1x!tpu.dma_semaphore, #tpu.memory_space<semaphore_mem>>
      %139 = tpu.memref_squeeze %138 : memref<1x!tpu.dma_semaphore, #tpu.memory_space<semaphore_mem>> -> memref<!tpu.dma_semaphore, #tpu.memory_space<semaphore_mem>>
      tpu.enqueue_dma source(%135 : memref<32xf32, #tpu.memory_space<any>>) target(%137 : memref<32xf32, #tpu.memory_space<vmem>>) target_semaphore(%139 : memref<!tpu.dma_semaphore, #tpu.memory_space<semaphore_mem>>)
    } else {
    }
    %c11_i32 = arith.constant 11 : i32
    %45 = arith.addi %0, %c11_i32 : i32
    %c16_i32_22 = arith.constant 16 : i32
    %46 = arith.cmpi slt, %45, %c16_i32_22 : i32
    %47 = arith.extui %46 : i1 to i32
    %c0_i32_23 = arith.constant 0 : i32
    %48 = arith.cmpi ne, %47, %c0_i32_23 : i32
    scf.if %48 {
      %c11_i32_80 = arith.constant 11 : i32
      %129 = arith.addi %0, %c11_i32_80 : i32
      %130 = arith.index_cast %129 : i32 to index
      %131 = memref.load %arg1[%130] : memref<16xi32, #tpu.memory_space<smem>>
      %c0_i32_81 = arith.constant 0 : i32
      %132 = arith.maxsi %131, %c0_i32_81 : i32
      %c49_i32 = arith.constant 49 : i32
      %133 = arith.minsi %132, %c49_i32 : i32
      %c11_i32_82 = arith.constant 11 : i32
      %c11_i32_83 = arith.constant 11 : i32
      %c0_i32_84 = arith.constant 0 : i32
      %134 = tpu.memref_slice %arg2[%133, %c0_i32_84] : memref<50x32xf32, #tpu.memory_space<any>> -> memref<1x32xf32, #tpu.memory_space<any>>
      %135 = tpu.memref_squeeze %134 : memref<1x32xf32, #tpu.memory_space<any>> -> memref<32xf32, #tpu.memory_space<any>>
      %c0_i32_85 = arith.constant 0 : i32
      %136 = tpu.memref_slice %arg3[%c11_i32_82, %c0_i32_85] : memref<16x32xf32, #tpu.memory_space<vmem>> -> memref<1x32xf32, #tpu.memory_space<vmem>>
      %137 = tpu.memref_squeeze %136 : memref<1x32xf32, #tpu.memory_space<vmem>> -> memref<32xf32, #tpu.memory_space<vmem>>
      %138 = tpu.memref_slice %arg4[%c11_i32_83] : memref<16x!tpu.dma_semaphore, #tpu.memory_space<semaphore_mem>> -> memref<1x!tpu.dma_semaphore, #tpu.memory_space<semaphore_mem>>
      %139 = tpu.memref_squeeze %138 : memref<1x!tpu.dma_semaphore, #tpu.memory_space<semaphore_mem>> -> memref<!tpu.dma_semaphore, #tpu.memory_space<semaphore_mem>>
      tpu.enqueue_dma source(%135 : memref<32xf32, #tpu.memory_space<any>>) target(%137 : memref<32xf32, #tpu.memory_space<vmem>>) target_semaphore(%139 : memref<!tpu.dma_semaphore, #tpu.memory_space<semaphore_mem>>)
    } else {
    }
    %c12_i32 = arith.constant 12 : i32
    %49 = arith.addi %0, %c12_i32 : i32
    %c16_i32_24 = arith.constant 16 : i32
    %50 = arith.cmpi slt, %49, %c16_i32_24 : i32
    %51 = arith.extui %50 : i1 to i32
    %c0_i32_25 = arith.constant 0 : i32
    %52 = arith.cmpi ne, %51, %c0_i32_25 : i32
    scf.if %52 {
      %c12_i32_80 = arith.constant 12 : i32
      %129 = arith.addi %0, %c12_i32_80 : i32
      %130 = arith.index_cast %129 : i32 to index
      %131 = memref.load %arg1[%130] : memref<16xi32, #tpu.memory_space<smem>>
      %c0_i32_81 = arith.constant 0 : i32
      %132 = arith.maxsi %131, %c0_i32_81 : i32
      %c49_i32 = arith.constant 49 : i32
      %133 = arith.minsi %132, %c49_i32 : i32
      %c12_i32_82 = arith.constant 12 : i32
      %c12_i32_83 = arith.constant 12 : i32
      %c0_i32_84 = arith.constant 0 : i32
      %134 = tpu.memref_slice %arg2[%133, %c0_i32_84] : memref<50x32xf32, #tpu.memory_space<any>> -> memref<1x32xf32, #tpu.memory_space<any>>
      %135 = tpu.memref_squeeze %134 : memref<1x32xf32, #tpu.memory_space<any>> -> memref<32xf32, #tpu.memory_space<any>>
      %c0_i32_85 = arith.constant 0 : i32
      %136 = tpu.memref_slice %arg3[%c12_i32_82, %c0_i32_85] : memref<16x32xf32, #tpu.memory_space<vmem>> -> memref<1x32xf32, #tpu.memory_space<vmem>>
      %137 = tpu.memref_squeeze %136 : memref<1x32xf32, #tpu.memory_space<vmem>> -> memref<32xf32, #tpu.memory_space<vmem>>
      %138 = tpu.memref_slice %arg4[%c12_i32_83] : memref<16x!tpu.dma_semaphore, #tpu.memory_space<semaphore_mem>> -> memref<1x!tpu.dma_semaphore, #tpu.memory_space<semaphore_mem>>
      %139 = tpu.memref_squeeze %138 : memref<1x!tpu.dma_semaphore, #tpu.memory_space<semaphore_mem>> -> memref<!tpu.dma_semaphore, #tpu.memory_space<semaphore_mem>>
      tpu.enqueue_dma source(%135 : memref<32xf32, #tpu.memory_space<any>>) target(%137 : memref<32xf32, #tpu.memory_space<vmem>>) target_semaphore(%139 : memref<!tpu.dma_semaphore, #tpu.memory_space<semaphore_mem>>)
    } else {
    }
    %c13_i32 = arith.constant 13 : i32
    %53 = arith.addi %0, %c13_i32 : i32
    %c16_i32_26 = arith.constant 16 : i32
    %54 = arith.cmpi slt, %53, %c16_i32_26 : i32
    %55 = arith.extui %54 : i1 to i32
    %c0_i32_27 = arith.constant 0 : i32
    %56 = arith.cmpi ne, %55, %c0_i32_27 : i32
    scf.if %56 {
      %c13_i32_80 = arith.constant 13 : i32
      %129 = arith.addi %0, %c13_i32_80 : i32
      %130 = arith.index_cast %129 : i32 to index
      %131 = memref.load %arg1[%130] : memref<16xi32, #tpu.memory_space<smem>>
      %c0_i32_81 = arith.constant 0 : i32
      %132 = arith.maxsi %131, %c0_i32_81 : i32
      %c49_i32 = arith.constant 49 : i32
      %133 = arith.minsi %132, %c49_i32 : i32
      %c13_i32_82 = arith.constant 13 : i32
      %c13_i32_83 = arith.constant 13 : i32
      %c0_i32_84 = arith.constant 0 : i32
      %134 = tpu.memref_slice %arg2[%133, %c0_i32_84] : memref<50x32xf32, #tpu.memory_space<any>> -> memref<1x32xf32, #tpu.memory_space<any>>
      %135 = tpu.memref_squeeze %134 : memref<1x32xf32, #tpu.memory_space<any>> -> memref<32xf32, #tpu.memory_space<any>>
      %c0_i32_85 = arith.constant 0 : i32
      %136 = tpu.memref_slice %arg3[%c13_i32_82, %c0_i32_85] : memref<16x32xf32, #tpu.memory_space<vmem>> -> memref<1x32xf32, #tpu.memory_space<vmem>>
      %137 = tpu.memref_squeeze %136 : memref<1x32xf32, #tpu.memory_space<vmem>> -> memref<32xf32, #tpu.memory_space<vmem>>
      %138 = tpu.memref_slice %arg4[%c13_i32_83] : memref<16x!tpu.dma_semaphore, #tpu.memory_space<semaphore_mem>> -> memref<1x!tpu.dma_semaphore, #tpu.memory_space<semaphore_mem>>
      %139 = tpu.memref_squeeze %138 : memref<1x!tpu.dma_semaphore, #tpu.memory_space<semaphore_mem>> -> memref<!tpu.dma_semaphore, #tpu.memory_space<semaphore_mem>>
      tpu.enqueue_dma source(%135 : memref<32xf32, #tpu.memory_space<any>>) target(%137 : memref<32xf32, #tpu.memory_space<vmem>>) target_semaphore(%139 : memref<!tpu.dma_semaphore, #tpu.memory_space<semaphore_mem>>)
    } else {
    }
    %c14_i32 = arith.constant 14 : i32
    %57 = arith.addi %0, %c14_i32 : i32
    %c16_i32_28 = arith.constant 16 : i32
    %58 = arith.cmpi slt, %57, %c16_i32_28 : i32
    %59 = arith.extui %58 : i1 to i32
    %c0_i32_29 = arith.constant 0 : i32
    %60 = arith.cmpi ne, %59, %c0_i32_29 : i32
    scf.if %60 {
      %c14_i32_80 = arith.constant 14 : i32
      %129 = arith.addi %0, %c14_i32_80 : i32
      %130 = arith.index_cast %129 : i32 to index
      %131 = memref.load %arg1[%130] : memref<16xi32, #tpu.memory_space<smem>>
      %c0_i32_81 = arith.constant 0 : i32
      %132 = arith.maxsi %131, %c0_i32_81 : i32
      %c49_i32 = arith.constant 49 : i32
      %133 = arith.minsi %132, %c49_i32 : i32
      %c14_i32_82 = arith.constant 14 : i32
      %c14_i32_83 = arith.constant 14 : i32
      %c0_i32_84 = arith.constant 0 : i32
      %134 = tpu.memref_slice %arg2[%133, %c0_i32_84] : memref<50x32xf32, #tpu.memory_space<any>> -> memref<1x32xf32, #tpu.memory_space<any>>
      %135 = tpu.memref_squeeze %134 : memref<1x32xf32, #tpu.memory_space<any>> -> memref<32xf32, #tpu.memory_space<any>>
      %c0_i32_85 = arith.constant 0 : i32
      %136 = tpu.memref_slice %arg3[%c14_i32_82, %c0_i32_85] : memref<16x32xf32, #tpu.memory_space<vmem>> -> memref<1x32xf32, #tpu.memory_space<vmem>>
      %137 = tpu.memref_squeeze %136 : memref<1x32xf32, #tpu.memory_space<vmem>> -> memref<32xf32, #tpu.memory_space<vmem>>
      %138 = tpu.memref_slice %arg4[%c14_i32_83] : memref<16x!tpu.dma_semaphore, #tpu.memory_space<semaphore_mem>> -> memref<1x!tpu.dma_semaphore, #tpu.memory_space<semaphore_mem>>
      %139 = tpu.memref_squeeze %138 : memref<1x!tpu.dma_semaphore, #tpu.memory_space<semaphore_mem>> -> memref<!tpu.dma_semaphore, #tpu.memory_space<semaphore_mem>>
      tpu.enqueue_dma source(%135 : memref<32xf32, #tpu.memory_space<any>>) target(%137 : memref<32xf32, #tpu.memory_space<vmem>>) target_semaphore(%139 : memref<!tpu.dma_semaphore, #tpu.memory_space<semaphore_mem>>)
    } else {
    }
    %c15_i32 = arith.constant 15 : i32
    %61 = arith.addi %0, %c15_i32 : i32
    %c16_i32_30 = arith.constant 16 : i32
    %62 = arith.cmpi slt, %61, %c16_i32_30 : i32
    %63 = arith.extui %62 : i1 to i32
    %c0_i32_31 = arith.constant 0 : i32
    %64 = arith.cmpi ne, %63, %c0_i32_31 : i32
    scf.if %64 {
      %c15_i32_80 = arith.constant 15 : i32
      %129 = arith.addi %0, %c15_i32_80 : i32
      %130 = arith.index_cast %129 : i32 to index
      %131 = memref.load %arg1[%130] : memref<16xi32, #tpu.memory_space<smem>>
      %c0_i32_81 = arith.constant 0 : i32
      %132 = arith.maxsi %131, %c0_i32_81 : i32
      %c49_i32 = arith.constant 49 : i32
      %133 = arith.minsi %132, %c49_i32 : i32
      %c15_i32_82 = arith.constant 15 : i32
      %c15_i32_83 = arith.constant 15 : i32
      %c0_i32_84 = arith.constant 0 : i32
      %134 = tpu.memref_slice %arg2[%133, %c0_i32_84] : memref<50x32xf32, #tpu.memory_space<any>> -> memref<1x32xf32, #tpu.memory_space<any>>
      %135 = tpu.memref_squeeze %134 : memref<1x32xf32, #tpu.memory_space<any>> -> memref<32xf32, #tpu.memory_space<any>>
      %c0_i32_85 = arith.constant 0 : i32
      %136 = tpu.memref_slice %arg3[%c15_i32_82, %c0_i32_85] : memref<16x32xf32, #tpu.memory_space<vmem>> -> memref<1x32xf32, #tpu.memory_space<vmem>>
      %137 = tpu.memref_squeeze %136 : memref<1x32xf32, #tpu.memory_space<vmem>> -> memref<32xf32, #tpu.memory_space<vmem>>
      %138 = tpu.memref_slice %arg4[%c15_i32_83] : memref<16x!tpu.dma_semaphore, #tpu.memory_space<semaphore_mem>> -> memref<1x!tpu.dma_semaphore, #tpu.memory_space<semaphore_mem>>
      %139 = tpu.memref_squeeze %138 : memref<1x!tpu.dma_semaphore, #tpu.memory_space<semaphore_mem>> -> memref<!tpu.dma_semaphore, #tpu.memory_space<semaphore_mem>>
      tpu.enqueue_dma source(%135 : memref<32xf32, #tpu.memory_space<any>>) target(%137 : memref<32xf32, #tpu.memory_space<vmem>>) target_semaphore(%139 : memref<!tpu.dma_semaphore, #tpu.memory_space<semaphore_mem>>)
    } else {
    }
    %c0_i32_32 = arith.constant 0 : i32
    %65 = arith.addi %0, %c0_i32_32 : i32
    %c16_i32_33 = arith.constant 16 : i32
    %66 = arith.cmpi slt, %65, %c16_i32_33 : i32
    %67 = arith.extui %66 : i1 to i32
    %c0_i32_34 = arith.constant 0 : i32
    %68 = arith.cmpi ne, %67, %c0_i32_34 : i32
    scf.if %68 {
      %c0_i32_80 = arith.constant 0 : i32
      %c0_i32_81 = arith.constant 0 : i32
      %c0_i32_82 = arith.constant 0 : i32
      %c0_i32_83 = arith.constant 0 : i32
      %129 = tpu.memref_slice %arg2[%c0_i32_80, %c0_i32_83] : memref<50x32xf32, #tpu.memory_space<any>> -> memref<1x32xf32, #tpu.memory_space<any>>
      %130 = tpu.memref_squeeze %129 : memref<1x32xf32, #tpu.memory_space<any>> -> memref<32xf32, #tpu.memory_space<any>>
      %c0_i32_84 = arith.constant 0 : i32
      %131 = tpu.memref_slice %arg3[%c0_i32_81, %c0_i32_84] : memref<16x32xf32, #tpu.memory_space<vmem>> -> memref<1x32xf32, #tpu.memory_space<vmem>>
      %132 = tpu.memref_squeeze %131 : memref<1x32xf32, #tpu.memory_space<vmem>> -> memref<32xf32, #tpu.memory_space<vmem>>
      %133 = tpu.memref_slice %arg4[%c0_i32_82] : memref<16x!tpu.dma_semaphore, #tpu.memory_space<semaphore_mem>> -> memref<1x!tpu.dma_semaphore, #tpu.memory_space<semaphore_mem>>
      %134 = tpu.memref_squeeze %133 : memref<1x!tpu.dma_semaphore, #tpu.memory_space<semaphore_mem>> -> memref<!tpu.dma_semaphore, #tpu.memory_space<semaphore_mem>>
      tpu.wait_dma2 semaphore(%134 : memref<!tpu.dma_semaphore, #tpu.memory_space<semaphore_mem>>) src(%130 : memref<32xf32, #tpu.memory_space<any>>) dst(%132 : memref<32xf32, #tpu.memory_space<vmem>>)
    } else {
    }
    %c1_i32_35 = arith.constant 1 : i32
    %69 = arith.addi %0, %c1_i32_35 : i32
    %c16_i32_36 = arith.constant 16 : i32
    %70 = arith.cmpi slt, %69, %c16_i32_36 : i32
    %71 = arith.extui %70 : i1 to i32
    %c0_i32_37 = arith.constant 0 : i32
    %72 = arith.cmpi ne, %71, %c0_i32_37 : i32
    scf.if %72 {
      %c0_i32_80 = arith.constant 0 : i32
      %c1_i32_81 = arith.constant 1 : i32
      %c1_i32_82 = arith.constant 1 : i32
      %c0_i32_83 = arith.constant 0 : i32
      %129 = tpu.memref_slice %arg2[%c0_i32_80, %c0_i32_83] : memref<50x32xf32, #tpu.memory_space<any>> -> memref<1x32xf32, #tpu.memory_space<any>>
      %130 = tpu.memref_squeeze %129 : memref<1x32xf32, #tpu.memory_space<any>> -> memref<32xf32, #tpu.memory_space<any>>
      %c0_i32_84 = arith.constant 0 : i32
      %131 = tpu.memref_slice %arg3[%c1_i32_81, %c0_i32_84] : memref<16x32xf32, #tpu.memory_space<vmem>> -> memref<1x32xf32, #tpu.memory_space<vmem>>
      %132 = tpu.memref_squeeze %131 : memref<1x32xf32, #tpu.memory_space<vmem>> -> memref<32xf32, #tpu.memory_space<vmem>>
      %133 = tpu.memref_slice %arg4[%c1_i32_82] : memref<16x!tpu.dma_semaphore, #tpu.memory_space<semaphore_mem>> -> memref<1x!tpu.dma_semaphore, #tpu.memory_space<semaphore_mem>>
      %134 = tpu.memref_squeeze %133 : memref<1x!tpu.dma_semaphore, #tpu.memory_space<semaphore_mem>> -> memref<!tpu.dma_semaphore, #tpu.memory_space<semaphore_mem>>
      tpu.wait_dma2 semaphore(%134 : memref<!tpu.dma_semaphore, #tpu.memory_space<semaphore_mem>>) src(%130 : memref<32xf32, #tpu.memory_space<any>>) dst(%132 : memref<32xf32, #tpu.memory_space<vmem>>)
    } else {
    }
    %c2_i32_38 = arith.constant 2 : i32
    %73 = arith.addi %0, %c2_i32_38 : i32
    %c16_i32_39 = arith.constant 16 : i32
    %74 = arith.cmpi slt, %73, %c16_i32_39 : i32
    %75 = arith.extui %74 : i1 to i32
    %c0_i32_40 = arith.constant 0 : i32
    %76 = arith.cmpi ne, %75, %c0_i32_40 : i32
    scf.if %76 {
      %c0_i32_80 = arith.constant 0 : i32
      %c2_i32_81 = arith.constant 2 : i32
      %c2_i32_82 = arith.constant 2 : i32
      %c0_i32_83 = arith.constant 0 : i32
      %129 = tpu.memref_slice %arg2[%c0_i32_80, %c0_i32_83] : memref<50x32xf32, #tpu.memory_space<any>> -> memref<1x32xf32, #tpu.memory_space<any>>
      %130 = tpu.memref_squeeze %129 : memref<1x32xf32, #tpu.memory_space<any>> -> memref<32xf32, #tpu.memory_space<any>>
      %c0_i32_84 = arith.constant 0 : i32
      %131 = tpu.memref_slice %arg3[%c2_i32_81, %c0_i32_84] : memref<16x32xf32, #tpu.memory_space<vmem>> -> memref<1x32xf32, #tpu.memory_space<vmem>>
      %132 = tpu.memref_squeeze %131 : memref<1x32xf32, #tpu.memory_space<vmem>> -> memref<32xf32, #tpu.memory_space<vmem>>
      %133 = tpu.memref_slice %arg4[%c2_i32_82] : memref<16x!tpu.dma_semaphore, #tpu.memory_space<semaphore_mem>> -> memref<1x!tpu.dma_semaphore, #tpu.memory_space<semaphore_mem>>
      %134 = tpu.memref_squeeze %133 : memref<1x!tpu.dma_semaphore, #tpu.memory_space<semaphore_mem>> -> memref<!tpu.dma_semaphore, #tpu.memory_space<semaphore_mem>>
      tpu.wait_dma2 semaphore(%134 : memref<!tpu.dma_semaphore, #tpu.memory_space<semaphore_mem>>) src(%130 : memref<32xf32, #tpu.memory_space<any>>) dst(%132 : memref<32xf32, #tpu.memory_space<vmem>>)
    } else {
    }
    %c3_i32_41 = arith.constant 3 : i32
    %77 = arith.addi %0, %c3_i32_41 : i32
    %c16_i32_42 = arith.constant 16 : i32
    %78 = arith.cmpi slt, %77, %c16_i32_42 : i32
    %79 = arith.extui %78 : i1 to i32
    %c0_i32_43 = arith.constant 0 : i32
    %80 = arith.cmpi ne, %79, %c0_i32_43 : i32
    scf.if %80 {
      %c0_i32_80 = arith.constant 0 : i32
      %c3_i32_81 = arith.constant 3 : i32
      %c3_i32_82 = arith.constant 3 : i32
      %c0_i32_83 = arith.constant 0 : i32
      %129 = tpu.memref_slice %arg2[%c0_i32_80, %c0_i32_83] : memref<50x32xf32, #tpu.memory_space<any>> -> memref<1x32xf32, #tpu.memory_space<any>>
      %130 = tpu.memref_squeeze %129 : memref<1x32xf32, #tpu.memory_space<any>> -> memref<32xf32, #tpu.memory_space<any>>
      %c0_i32_84 = arith.constant 0 : i32
      %131 = tpu.memref_slice %arg3[%c3_i32_81, %c0_i32_84] : memref<16x32xf32, #tpu.memory_space<vmem>> -> memref<1x32xf32, #tpu.memory_space<vmem>>
      %132 = tpu.memref_squeeze %131 : memref<1x32xf32, #tpu.memory_space<vmem>> -> memref<32xf32, #tpu.memory_space<vmem>>
      %133 = tpu.memref_slice %arg4[%c3_i32_82] : memref<16x!tpu.dma_semaphore, #tpu.memory_space<semaphore_mem>> -> memref<1x!tpu.dma_semaphore, #tpu.memory_space<semaphore_mem>>
      %134 = tpu.memref_squeeze %133 : memref<1x!tpu.dma_semaphore, #tpu.memory_space<semaphore_mem>> -> memref<!tpu.dma_semaphore, #tpu.memory_space<semaphore_mem>>
      tpu.wait_dma2 semaphore(%134 : memref<!tpu.dma_semaphore, #tpu.memory_space<semaphore_mem>>) src(%130 : memref<32xf32, #tpu.memory_space<any>>) dst(%132 : memref<32xf32, #tpu.memory_space<vmem>>)
    } else {
    }
    %c4_i32_44 = arith.constant 4 : i32
    %81 = arith.addi %0, %c4_i32_44 : i32
    %c16_i32_45 = arith.constant 16 : i32
    %82 = arith.cmpi slt, %81, %c16_i32_45 : i32
    %83 = arith.extui %82 : i1 to i32
    %c0_i32_46 = arith.constant 0 : i32
    %84 = arith.cmpi ne, %83, %c0_i32_46 : i32
    scf.if %84 {
      %c0_i32_80 = arith.constant 0 : i32
      %c4_i32_81 = arith.constant 4 : i32
      %c4_i32_82 = arith.constant 4 : i32
      %c0_i32_83 = arith.constant 0 : i32
      %129 = tpu.memref_slice %arg2[%c0_i32_80, %c0_i32_83] : memref<50x32xf32, #tpu.memory_space<any>> -> memref<1x32xf32, #tpu.memory_space<any>>
      %130 = tpu.memref_squeeze %129 : memref<1x32xf32, #tpu.memory_space<any>> -> memref<32xf32, #tpu.memory_space<any>>
      %c0_i32_84 = arith.constant 0 : i32
      %131 = tpu.memref_slice %arg3[%c4_i32_81, %c0_i32_84] : memref<16x32xf32, #tpu.memory_space<vmem>> -> memref<1x32xf32, #tpu.memory_space<vmem>>
      %132 = tpu.memref_squeeze %131 : memref<1x32xf32, #tpu.memory_space<vmem>> -> memref<32xf32, #tpu.memory_space<vmem>>
      %133 = tpu.memref_slice %arg4[%c4_i32_82] : memref<16x!tpu.dma_semaphore, #tpu.memory_space<semaphore_mem>> -> memref<1x!tpu.dma_semaphore, #tpu.memory_space<semaphore_mem>>
      %134 = tpu.memref_squeeze %133 : memref<1x!tpu.dma_semaphore, #tpu.memory_space<semaphore_mem>> -> memref<!tpu.dma_semaphore, #tpu.memory_space<semaphore_mem>>
      tpu.wait_dma2 semaphore(%134 : memref<!tpu.dma_semaphore, #tpu.memory_space<semaphore_mem>>) src(%130 : memref<32xf32, #tpu.memory_space<any>>) dst(%132 : memref<32xf32, #tpu.memory_space<vmem>>)
    } else {
    }
    %c5_i32_47 = arith.constant 5 : i32
    %85 = arith.addi %0, %c5_i32_47 : i32
    %c16_i32_48 = arith.constant 16 : i32
    %86 = arith.cmpi slt, %85, %c16_i32_48 : i32
    %87 = arith.extui %86 : i1 to i32
    %c0_i32_49 = arith.constant 0 : i32
    %88 = arith.cmpi ne, %87, %c0_i32_49 : i32
    scf.if %88 {
      %c0_i32_80 = arith.constant 0 : i32
      %c5_i32_81 = arith.constant 5 : i32
      %c5_i32_82 = arith.constant 5 : i32
      %c0_i32_83 = arith.constant 0 : i32
      %129 = tpu.memref_slice %arg2[%c0_i32_80, %c0_i32_83] : memref<50x32xf32, #tpu.memory_space<any>> -> memref<1x32xf32, #tpu.memory_space<any>>
      %130 = tpu.memref_squeeze %129 : memref<1x32xf32, #tpu.memory_space<any>> -> memref<32xf32, #tpu.memory_space<any>>
      %c0_i32_84 = arith.constant 0 : i32
      %131 = tpu.memref_slice %arg3[%c5_i32_81, %c0_i32_84] : memref<16x32xf32, #tpu.memory_space<vmem>> -> memref<1x32xf32, #tpu.memory_space<vmem>>
      %132 = tpu.memref_squeeze %131 : memref<1x32xf32, #tpu.memory_space<vmem>> -> memref<32xf32, #tpu.memory_space<vmem>>
      %133 = tpu.memref_slice %arg4[%c5_i32_82] : memref<16x!tpu.dma_semaphore, #tpu.memory_space<semaphore_mem>> -> memref<1x!tpu.dma_semaphore, #tpu.memory_space<semaphore_mem>>
      %134 = tpu.memref_squeeze %133 : memref<1x!tpu.dma_semaphore, #tpu.memory_space<semaphore_mem>> -> memref<!tpu.dma_semaphore, #tpu.memory_space<semaphore_mem>>
      tpu.wait_dma2 semaphore(%134 : memref<!tpu.dma_semaphore, #tpu.memory_space<semaphore_mem>>) src(%130 : memref<32xf32, #tpu.memory_space<any>>) dst(%132 : memref<32xf32, #tpu.memory_space<vmem>>)
    } else {
    }
    %c6_i32_50 = arith.constant 6 : i32
    %89 = arith.addi %0, %c6_i32_50 : i32
    %c16_i32_51 = arith.constant 16 : i32
    %90 = arith.cmpi slt, %89, %c16_i32_51 : i32
    %91 = arith.extui %90 : i1 to i32
    %c0_i32_52 = arith.constant 0 : i32
    %92 = arith.cmpi ne, %91, %c0_i32_52 : i32
    scf.if %92 {
      %c0_i32_80 = arith.constant 0 : i32
      %c6_i32_81 = arith.constant 6 : i32
      %c6_i32_82 = arith.constant 6 : i32
      %c0_i32_83 = arith.constant 0 : i32
      %129 = tpu.memref_slice %arg2[%c0_i32_80, %c0_i32_83] : memref<50x32xf32, #tpu.memory_space<any>> -> memref<1x32xf32, #tpu.memory_space<any>>
      %130 = tpu.memref_squeeze %129 : memref<1x32xf32, #tpu.memory_space<any>> -> memref<32xf32, #tpu.memory_space<any>>
      %c0_i32_84 = arith.constant 0 : i32
      %131 = tpu.memref_slice %arg3[%c6_i32_81, %c0_i32_84] : memref<16x32xf32, #tpu.memory_space<vmem>> -> memref<1x32xf32, #tpu.memory_space<vmem>>
      %132 = tpu.memref_squeeze %131 : memref<1x32xf32, #tpu.memory_space<vmem>> -> memref<32xf32, #tpu.memory_space<vmem>>
      %133 = tpu.memref_slice %arg4[%c6_i32_82] : memref<16x!tpu.dma_semaphore, #tpu.memory_space<semaphore_mem>> -> memref<1x!tpu.dma_semaphore, #tpu.memory_space<semaphore_mem>>
      %134 = tpu.memref_squeeze %133 : memref<1x!tpu.dma_semaphore, #tpu.memory_space<semaphore_mem>> -> memref<!tpu.dma_semaphore, #tpu.memory_space<semaphore_mem>>
      tpu.wait_dma2 semaphore(%134 : memref<!tpu.dma_semaphore, #tpu.memory_space<semaphore_mem>>) src(%130 : memref<32xf32, #tpu.memory_space<any>>) dst(%132 : memref<32xf32, #tpu.memory_space<vmem>>)
    } else {
    }
    %c7_i32_53 = arith.constant 7 : i32
    %93 = arith.addi %0, %c7_i32_53 : i32
    %c16_i32_54 = arith.constant 16 : i32
    %94 = arith.cmpi slt, %93, %c16_i32_54 : i32
    %95 = arith.extui %94 : i1 to i32
    %c0_i32_55 = arith.constant 0 : i32
    %96 = arith.cmpi ne, %95, %c0_i32_55 : i32
    scf.if %96 {
      %c0_i32_80 = arith.constant 0 : i32
      %c7_i32_81 = arith.constant 7 : i32
      %c7_i32_82 = arith.constant 7 : i32
      %c0_i32_83 = arith.constant 0 : i32
      %129 = tpu.memref_slice %arg2[%c0_i32_80, %c0_i32_83] : memref<50x32xf32, #tpu.memory_space<any>> -> memref<1x32xf32, #tpu.memory_space<any>>
      %130 = tpu.memref_squeeze %129 : memref<1x32xf32, #tpu.memory_space<any>> -> memref<32xf32, #tpu.memory_space<any>>
      %c0_i32_84 = arith.constant 0 : i32
      %131 = tpu.memref_slice %arg3[%c7_i32_81, %c0_i32_84] : memref<16x32xf32, #tpu.memory_space<vmem>> -> memref<1x32xf32, #tpu.memory_space<vmem>>
      %132 = tpu.memref_squeeze %131 : memref<1x32xf32, #tpu.memory_space<vmem>> -> memref<32xf32, #tpu.memory_space<vmem>>
      %133 = tpu.memref_slice %arg4[%c7_i32_82] : memref<16x!tpu.dma_semaphore, #tpu.memory_space<semaphore_mem>> -> memref<1x!tpu.dma_semaphore, #tpu.memory_space<semaphore_mem>>
      %134 = tpu.memref_squeeze %133 : memref<1x!tpu.dma_semaphore, #tpu.memory_space<semaphore_mem>> -> memref<!tpu.dma_semaphore, #tpu.memory_space<semaphore_mem>>
      tpu.wait_dma2 semaphore(%134 : memref<!tpu.dma_semaphore, #tpu.memory_space<semaphore_mem>>) src(%130 : memref<32xf32, #tpu.memory_space<any>>) dst(%132 : memref<32xf32, #tpu.memory_space<vmem>>)
    } else {
    }
    %c8_i32_56 = arith.constant 8 : i32
    %97 = arith.addi %0, %c8_i32_56 : i32
    %c16_i32_57 = arith.constant 16 : i32
    %98 = arith.cmpi slt, %97, %c16_i32_57 : i32
    %99 = arith.extui %98 : i1 to i32
    %c0_i32_58 = arith.constant 0 : i32
    %100 = arith.cmpi ne, %99, %c0_i32_58 : i32
    scf.if %100 {
      %c0_i32_80 = arith.constant 0 : i32
      %c8_i32_81 = arith.constant 8 : i32
      %c8_i32_82 = arith.constant 8 : i32
      %c0_i32_83 = arith.constant 0 : i32
      %129 = tpu.memref_slice %arg2[%c0_i32_80, %c0_i32_83] : memref<50x32xf32, #tpu.memory_space<any>> -> memref<1x32xf32, #tpu.memory_space<any>>
      %130 = tpu.memref_squeeze %129 : memref<1x32xf32, #tpu.memory_space<any>> -> memref<32xf32, #tpu.memory_space<any>>
      %c0_i32_84 = arith.constant 0 : i32
      %131 = tpu.memref_slice %arg3[%c8_i32_81, %c0_i32_84] : memref<16x32xf32, #tpu.memory_space<vmem>> -> memref<1x32xf32, #tpu.memory_space<vmem>>
      %132 = tpu.memref_squeeze %131 : memref<1x32xf32, #tpu.memory_space<vmem>> -> memref<32xf32, #tpu.memory_space<vmem>>
      %133 = tpu.memref_slice %arg4[%c8_i32_82] : memref<16x!tpu.dma_semaphore, #tpu.memory_space<semaphore_mem>> -> memref<1x!tpu.dma_semaphore, #tpu.memory_space<semaphore_mem>>
      %134 = tpu.memref_squeeze %133 : memref<1x!tpu.dma_semaphore, #tpu.memory_space<semaphore_mem>> -> memref<!tpu.dma_semaphore, #tpu.memory_space<semaphore_mem>>
      tpu.wait_dma2 semaphore(%134 : memref<!tpu.dma_semaphore, #tpu.memory_space<semaphore_mem>>) src(%130 : memref<32xf32, #tpu.memory_space<any>>) dst(%132 : memref<32xf32, #tpu.memory_space<vmem>>)
    } else {
    }
    %c9_i32_59 = arith.constant 9 : i32
    %101 = arith.addi %0, %c9_i32_59 : i32
    %c16_i32_60 = arith.constant 16 : i32
    %102 = arith.cmpi slt, %101, %c16_i32_60 : i32
    %103 = arith.extui %102 : i1 to i32
    %c0_i32_61 = arith.constant 0 : i32
    %104 = arith.cmpi ne, %103, %c0_i32_61 : i32
    scf.if %104 {
      %c0_i32_80 = arith.constant 0 : i32
      %c9_i32_81 = arith.constant 9 : i32
      %c9_i32_82 = arith.constant 9 : i32
      %c0_i32_83 = arith.constant 0 : i32
      %129 = tpu.memref_slice %arg2[%c0_i32_80, %c0_i32_83] : memref<50x32xf32, #tpu.memory_space<any>> -> memref<1x32xf32, #tpu.memory_space<any>>
      %130 = tpu.memref_squeeze %129 : memref<1x32xf32, #tpu.memory_space<any>> -> memref<32xf32, #tpu.memory_space<any>>
      %c0_i32_84 = arith.constant 0 : i32
      %131 = tpu.memref_slice %arg3[%c9_i32_81, %c0_i32_84] : memref<16x32xf32, #tpu.memory_space<vmem>> -> memref<1x32xf32, #tpu.memory_space<vmem>>
      %132 = tpu.memref_squeeze %131 : memref<1x32xf32, #tpu.memory_space<vmem>> -> memref<32xf32, #tpu.memory_space<vmem>>
      %133 = tpu.memref_slice %arg4[%c9_i32_82] : memref<16x!tpu.dma_semaphore, #tpu.memory_space<semaphore_mem>> -> memref<1x!tpu.dma_semaphore, #tpu.memory_space<semaphore_mem>>
      %134 = tpu.memref_squeeze %133 : memref<1x!tpu.dma_semaphore, #tpu.memory_space<semaphore_mem>> -> memref<!tpu.dma_semaphore, #tpu.memory_space<semaphore_mem>>
      tpu.wait_dma2 semaphore(%134 : memref<!tpu.dma_semaphore, #tpu.memory_space<semaphore_mem>>) src(%130 : memref<32xf32, #tpu.memory_space<any>>) dst(%132 : memref<32xf32, #tpu.memory_space<vmem>>)
    } else {
    }
    %c10_i32_62 = arith.constant 10 : i32
    %105 = arith.addi %0, %c10_i32_62 : i32
    %c16_i32_63 = arith.constant 16 : i32
    %106 = arith.cmpi slt, %105, %c16_i32_63 : i32
    %107 = arith.extui %106 : i1 to i32
    %c0_i32_64 = arith.constant 0 : i32
    %108 = arith.cmpi ne, %107, %c0_i32_64 : i32
    scf.if %108 {
      %c0_i32_80 = arith.constant 0 : i32
      %c10_i32_81 = arith.constant 10 : i32
      %c10_i32_82 = arith.constant 10 : i32
      %c0_i32_83 = arith.constant 0 : i32
      %129 = tpu.memref_slice %arg2[%c0_i32_80, %c0_i32_83] : memref<50x32xf32, #tpu.memory_space<any>> -> memref<1x32xf32, #tpu.memory_space<any>>
      %130 = tpu.memref_squeeze %129 : memref<1x32xf32, #tpu.memory_space<any>> -> memref<32xf32, #tpu.memory_space<any>>
      %c0_i32_84 = arith.constant 0 : i32
      %131 = tpu.memref_slice %arg3[%c10_i32_81, %c0_i32_84] : memref<16x32xf32, #tpu.memory_space<vmem>> -> memref<1x32xf32, #tpu.memory_space<vmem>>
      %132 = tpu.memref_squeeze %131 : memref<1x32xf32, #tpu.memory_space<vmem>> -> memref<32xf32, #tpu.memory_space<vmem>>
      %133 = tpu.memref_slice %arg4[%c10_i32_82] : memref<16x!tpu.dma_semaphore, #tpu.memory_space<semaphore_mem>> -> memref<1x!tpu.dma_semaphore, #tpu.memory_space<semaphore_mem>>
      %134 = tpu.memref_squeeze %133 : memref<1x!tpu.dma_semaphore, #tpu.memory_space<semaphore_mem>> -> memref<!tpu.dma_semaphore, #tpu.memory_space<semaphore_mem>>
      tpu.wait_dma2 semaphore(%134 : memref<!tpu.dma_semaphore, #tpu.memory_space<semaphore_mem>>) src(%130 : memref<32xf32, #tpu.memory_space<any>>) dst(%132 : memref<32xf32, #tpu.memory_space<vmem>>)
    } else {
    }
    %c11_i32_65 = arith.constant 11 : i32
    %109 = arith.addi %0, %c11_i32_65 : i32
    %c16_i32_66 = arith.constant 16 : i32
    %110 = arith.cmpi slt, %109, %c16_i32_66 : i32
    %111 = arith.extui %110 : i1 to i32
    %c0_i32_67 = arith.constant 0 : i32
    %112 = arith.cmpi ne, %111, %c0_i32_67 : i32
    scf.if %112 {
      %c0_i32_80 = arith.constant 0 : i32
      %c11_i32_81 = arith.constant 11 : i32
      %c11_i32_82 = arith.constant 11 : i32
      %c0_i32_83 = arith.constant 0 : i32
      %129 = tpu.memref_slice %arg2[%c0_i32_80, %c0_i32_83] : memref<50x32xf32, #tpu.memory_space<any>> -> memref<1x32xf32, #tpu.memory_space<any>>
      %130 = tpu.memref_squeeze %129 : memref<1x32xf32, #tpu.memory_space<any>> -> memref<32xf32, #tpu.memory_space<any>>
      %c0_i32_84 = arith.constant 0 : i32
      %131 = tpu.memref_slice %arg3[%c11_i32_81, %c0_i32_84] : memref<16x32xf32, #tpu.memory_space<vmem>> -> memref<1x32xf32, #tpu.memory_space<vmem>>
      %132 = tpu.memref_squeeze %131 : memref<1x32xf32, #tpu.memory_space<vmem>> -> memref<32xf32, #tpu.memory_space<vmem>>
      %133 = tpu.memref_slice %arg4[%c11_i32_82] : memref<16x!tpu.dma_semaphore, #tpu.memory_space<semaphore_mem>> -> memref<1x!tpu.dma_semaphore, #tpu.memory_space<semaphore_mem>>
      %134 = tpu.memref_squeeze %133 : memref<1x!tpu.dma_semaphore, #tpu.memory_space<semaphore_mem>> -> memref<!tpu.dma_semaphore, #tpu.memory_space<semaphore_mem>>
      tpu.wait_dma2 semaphore(%134 : memref<!tpu.dma_semaphore, #tpu.memory_space<semaphore_mem>>) src(%130 : memref<32xf32, #tpu.memory_space<any>>) dst(%132 : memref<32xf32, #tpu.memory_space<vmem>>)
    } else {
    }
    %c12_i32_68 = arith.constant 12 : i32
    %113 = arith.addi %0, %c12_i32_68 : i32
    %c16_i32_69 = arith.constant 16 : i32
    %114 = arith.cmpi slt, %113, %c16_i32_69 : i32
    %115 = arith.extui %114 : i1 to i32
    %c0_i32_70 = arith.constant 0 : i32
    %116 = arith.cmpi ne, %115, %c0_i32_70 : i32
    scf.if %116 {
      %c0_i32_80 = arith.constant 0 : i32
      %c12_i32_81 = arith.constant 12 : i32
      %c12_i32_82 = arith.constant 12 : i32
      %c0_i32_83 = arith.constant 0 : i32
      %129 = tpu.memref_slice %arg2[%c0_i32_80, %c0_i32_83] : memref<50x32xf32, #tpu.memory_space<any>> -> memref<1x32xf32, #tpu.memory_space<any>>
      %130 = tpu.memref_squeeze %129 : memref<1x32xf32, #tpu.memory_space<any>> -> memref<32xf32, #tpu.memory_space<any>>
      %c0_i32_84 = arith.constant 0 : i32
      %131 = tpu.memref_slice %arg3[%c12_i32_81, %c0_i32_84] : memref<16x32xf32, #tpu.memory_space<vmem>> -> memref<1x32xf32, #tpu.memory_space<vmem>>
      %132 = tpu.memref_squeeze %131 : memref<1x32xf32, #tpu.memory_space<vmem>> -> memref<32xf32, #tpu.memory_space<vmem>>
      %133 = tpu.memref_slice %arg4[%c12_i32_82] : memref<16x!tpu.dma_semaphore, #tpu.memory_space<semaphore_mem>> -> memref<1x!tpu.dma_semaphore, #tpu.memory_space<semaphore_mem>>
      %134 = tpu.memref_squeeze %133 : memref<1x!tpu.dma_semaphore, #tpu.memory_space<semaphore_mem>> -> memref<!tpu.dma_semaphore, #tpu.memory_space<semaphore_mem>>
      tpu.wait_dma2 semaphore(%134 : memref<!tpu.dma_semaphore, #tpu.memory_space<semaphore_mem>>) src(%130 : memref<32xf32, #tpu.memory_space<any>>) dst(%132 : memref<32xf32, #tpu.memory_space<vmem>>)
    } else {
    }
    %c13_i32_71 = arith.constant 13 : i32
    %117 = arith.addi %0, %c13_i32_71 : i32
    %c16_i32_72 = arith.constant 16 : i32
    %118 = arith.cmpi slt, %117, %c16_i32_72 : i32
    %119 = arith.extui %118 : i1 to i32
    %c0_i32_73 = arith.constant 0 : i32
    %120 = arith.cmpi ne, %119, %c0_i32_73 : i32
    scf.if %120 {
      %c0_i32_80 = arith.constant 0 : i32
      %c13_i32_81 = arith.constant 13 : i32
      %c13_i32_82 = arith.constant 13 : i32
      %c0_i32_83 = arith.constant 0 : i32
      %129 = tpu.memref_slice %arg2[%c0_i32_80, %c0_i32_83] : memref<50x32xf32, #tpu.memory_space<any>> -> memref<1x32xf32, #tpu.memory_space<any>>
      %130 = tpu.memref_squeeze %129 : memref<1x32xf32, #tpu.memory_space<any>> -> memref<32xf32, #tpu.memory_space<any>>
      %c0_i32_84 = arith.constant 0 : i32
      %131 = tpu.memref_slice %arg3[%c13_i32_81, %c0_i32_84] : memref<16x32xf32, #tpu.memory_space<vmem>> -> memref<1x32xf32, #tpu.memory_space<vmem>>
      %132 = tpu.memref_squeeze %131 : memref<1x32xf32, #tpu.memory_space<vmem>> -> memref<32xf32, #tpu.memory_space<vmem>>
      %133 = tpu.memref_slice %arg4[%c13_i32_82] : memref<16x!tpu.dma_semaphore, #tpu.memory_space<semaphore_mem>> -> memref<1x!tpu.dma_semaphore, #tpu.memory_space<semaphore_mem>>
      %134 = tpu.memref_squeeze %133 : memref<1x!tpu.dma_semaphore, #tpu.memory_space<semaphore_mem>> -> memref<!tpu.dma_semaphore, #tpu.memory_space<semaphore_mem>>
      tpu.wait_dma2 semaphore(%134 : memref<!tpu.dma_semaphore, #tpu.memory_space<semaphore_mem>>) src(%130 : memref<32xf32, #tpu.memory_space<any>>) dst(%132 : memref<32xf32, #tpu.memory_space<vmem>>)
    } else {
    }
    %c14_i32_74 = arith.constant 14 : i32
    %121 = arith.addi %0, %c14_i32_74 : i32
    %c16_i32_75 = arith.constant 16 : i32
    %122 = arith.cmpi slt, %121, %c16_i32_75 : i32
    %123 = arith.extui %122 : i1 to i32
    %c0_i32_76 = arith.constant 0 : i32
    %124 = arith.cmpi ne, %123, %c0_i32_76 : i32
    scf.if %124 {
      %c0_i32_80 = arith.constant 0 : i32
      %c14_i32_81 = arith.constant 14 : i32
      %c14_i32_82 = arith.constant 14 : i32
      %c0_i32_83 = arith.constant 0 : i32
      %129 = tpu.memref_slice %arg2[%c0_i32_80, %c0_i32_83] : memref<50x32xf32, #tpu.memory_space<any>> -> memref<1x32xf32, #tpu.memory_space<any>>
      %130 = tpu.memref_squeeze %129 : memref<1x32xf32, #tpu.memory_space<any>> -> memref<32xf32, #tpu.memory_space<any>>
      %c0_i32_84 = arith.constant 0 : i32
      %131 = tpu.memref_slice %arg3[%c14_i32_81, %c0_i32_84] : memref<16x32xf32, #tpu.memory_space<vmem>> -> memref<1x32xf32, #tpu.memory_space<vmem>>
      %132 = tpu.memref_squeeze %131 : memref<1x32xf32, #tpu.memory_space<vmem>> -> memref<32xf32, #tpu.memory_space<vmem>>
      %133 = tpu.memref_slice %arg4[%c14_i32_82] : memref<16x!tpu.dma_semaphore, #tpu.memory_space<semaphore_mem>> -> memref<1x!tpu.dma_semaphore, #tpu.memory_space<semaphore_mem>>
      %134 = tpu.memref_squeeze %133 : memref<1x!tpu.dma_semaphore, #tpu.memory_space<semaphore_mem>> -> memref<!tpu.dma_semaphore, #tpu.memory_space<semaphore_mem>>
      tpu.wait_dma2 semaphore(%134 : memref<!tpu.dma_semaphore, #tpu.memory_space<semaphore_mem>>) src(%130 : memref<32xf32, #tpu.memory_space<any>>) dst(%132 : memref<32xf32, #tpu.memory_space<vmem>>)
    } else {
    }
    %c15_i32_77 = arith.constant 15 : i32
    %125 = arith.addi %0, %c15_i32_77 : i32
    %c16_i32_78 = arith.constant 16 : i32
    %126 = arith.cmpi slt, %125, %c16_i32_78 : i32
    %127 = arith.extui %126 : i1 to i32
    %c0_i32_79 = arith.constant 0 : i32
    %128 = arith.cmpi ne, %127, %c0_i32_79 : i32
    scf.if %128 {
      %c0_i32_80 = arith.constant 0 : i32
      %c15_i32_81 = arith.constant 15 : i32
      %c15_i32_82 = arith.constant 15 : i32
      %c0_i32_83 = arith.constant 0 : i32
      %129 = tpu.memref_slice %arg2[%c0_i32_80, %c0_i32_83] : memref<50x32xf32, #tpu.memory_space<any>> -> memref<1x32xf32, #tpu.memory_space<any>>
      %130 = tpu.memref_squeeze %129 : memref<1x32xf32, #tpu.memory_space<any>> -> memref<32xf32, #tpu.memory_space<any>>
      %c0_i32_84 = arith.constant 0 : i32
      %131 = tpu.memref_slice %arg3[%c15_i32_81, %c0_i32_84] : memref<16x32xf32, #tpu.memory_space<vmem>> -> memref<1x32xf32, #tpu.memory_space<vmem>>
      %132 = tpu.memref_squeeze %131 : memref<1x32xf32, #tpu.memory_space<vmem>> -> memref<32xf32, #tpu.memory_space<vmem>>
      %133 = tpu.memref_slice %arg4[%c15_i32_82] : memref<16x!tpu.dma_semaphore, #tpu.memory_space<semaphore_mem>> -> memref<1x!tpu.dma_semaphore, #tpu.memory_space<semaphore_mem>>
      %134 = tpu.memref_squeeze %133 : memref<1x!tpu.dma_semaphore, #tpu.memory_space<semaphore_mem>> -> memref<!tpu.dma_semaphore, #tpu.memory_space<semaphore_mem>>
      tpu.wait_dma2 semaphore(%134 : memref<!tpu.dma_semaphore, #tpu.memory_space<semaphore_mem>>) src(%130 : memref<32xf32, #tpu.memory_space<any>>) dst(%132 : memref<32xf32, #tpu.memory_space<vmem>>)
    } else {
    }
    return
  }
  func.func @transform_1(%arg0: i32, %arg1: memref<16xi32, #tpu.memory_space<smem>>) -> (i32, i32) {
    %c0_i32 = arith.constant 0 : i32
    %c0_i32_0 = arith.constant 0 : i32
    return %arg0, %c0_i32 : i32, i32
  }
}

</mosaic_0001>

<bundles_post_ra>
// kernel: tpu_custom_call.1
= control target key start
LH: loop header
LB: loop body
LE: loop exit
PB: predicated region body
PF: predicated region fallthrough
CT: control target
= control target key end

     0   :  { %s1289_s12 = smov [#allocation4]   ;;  %s1362_s0 = inlined_call_operand.vmem [shape: s32[16], index: 0, kind: input, shape index: {}]   ;;  %s1363_s1 = inlined_call_operand.vmem [shape: f32[50,32], index: 1, kind: input, shape index: {}]   ;;  %s1364_s2 = inlined_call_operand.hbm [shape: f32[16,32], index: 2, kind: output, shape index: {}]  }
   0x1   :  { %s8_s11 = sshll.u32 %s1362_s0, 4  ;;  %s9_s11 = int_to_ptr.vmem [resolvable:$true] %s8_s11 }
   0x2   :  { %11 = dma.vmem_to_smem %s9_s11, 16, %s1289_s12, [#allocation3] }
   0x3   :  { %1253 = dma.done.wait [#allocation3], 16 }
   0x4   :  { %1254 = vsyncadd [#allocation3], 4294967280 }
   0x5   :  { %14 = sfence }
   0x6   :  { %15 = vsyncpa [#allocation6], 0  ;;  %s21_s13 = sld [smem:[#allocation4]] }
   0xc   :  { %p22_p0 = scmp.gt.s32.totalorder %s21_s13, 0  ;;  %p1070_p1 = scmp.lt.s32.totalorder %s21_s13, 49 }
   0xe   :  { %s1366_s13 = smov (!%p22_p0, %s21_s13), 0 }
   0xf   :  { %s1368_s13 = smov (!%p1070_p1, %s1366_s13), 49 }
  0x10   :  { %s26_s16 = scalar_lea.vmem %s1363_s1, %s1368_s13 }
  0x11   :  { %v41_v0 = vld [vmem:[%s26_s16] sm:$0x1] }
  0x12   :  { %42 = vst [vmem:[#allocation5] sm:$0x1] %v41_v0 }
  0x13   :  { %60 = vsyncadd [#allocation2], 16  ;;  %s1075_s0 = sld [smem:[#allocation4 + $0x1]] }
  0x19   :  { %p67_p2 = scmp.gt.s32.totalorder %s1075_s0, 0  ;;  %p1076_p3 = scmp.lt.s32.totalorder %s1075_s0, 49 }
  0x1b   :  { %s1370_s0 = smov (!%p67_p2, %s1075_s0), 0 }
  0x1c   :  { %s1372_s0 = smov (!%p1076_p3, %s1370_s0), 49 }
  0x1d   :  { %s71_s19 = scalar_lea.vmem %s1363_s1, %s1372_s0 }
  0x1e   :  { %v88_v1 = vld [vmem:[%s71_s19] sm:$0x1] }
  0x1f   :  { %89 = vst [vmem:[#allocation5 + $0x1] sm:$0x1] %v88_v1 }
  0x20   :  { %107 = vsyncadd [#allocation2 + $0x1], 16  ;;  %s1081_s20 = sld [smem:[#allocation4 + $0x2]] }
  0x26   :  { %p114_p4 = scmp.gt.s32.totalorder %s1081_s20, 0  ;;  %p1082_p5 = scmp.lt.s32.totalorder %s1081_s20, 49 }
  0x28   :  { %s1374_s20 = smov (!%p114_p4, %s1081_s20), 0 }
  0x29   :  { %s1376_s20 = smov (!%p1082_p5, %s1374_s20), 49 }
  0x2a   :  { %s118_s23 = scalar_lea.vmem %s1363_s1, %s1376_s20 }
  0x2b   :  { %v135_v2 = vld [vmem:[%s118_s23] sm:$0x1] }
  0x2c   :  { %136 = vst [vmem:[#allocation5 + $0x2] sm:$0x1] %v135_v2 }
  0x2d   :  { %154 = vsyncadd [#allocation2 + $0x2], 16  ;;  %s1087_s24 = sld [smem:[#allocation4 + $0x3]] }
  0x33   :  { %p161_p6 = scmp.gt.s32.totalorder %s1087_s24, 0  ;;  %p1088_p7 = scmp.lt.s32.totalorder %s1087_s24, 49 }
  0x35   :  { %s1378_s24 = smov (!%p161_p6, %s1087_s24), 0 }
  0x36   :  { %s1380_s24 = smov (!%p1088_p7, %s1378_s24), 49 }
  0x37   :  { %s165_s27 = scalar_lea.vmem %s1363_s1, %s1380_s24 }
  0x38   :  { %v182_v3 = vld [vmem:[%s165_s27] sm:$0x1] }
  0x39   :  { %183 = vst [vmem:[#allocation5 + $0x3] sm:$0x1] %v182_v3 }
  0x3a   :  { %201 = vsyncadd [#allocation2 + $0x3], 16  ;;  %s1093_s28 = sld [smem:[#allocation4 + $0x4]] }
  0x40   :  { %p208_p8 = scmp.gt.s32.totalorder %s1093_s28, 0  ;;  %p1094_p9 = scmp.lt.s32.totalorder %s1093_s28, 49 }
  0x42   :  { %s1382_s28 = smov (!%p208_p8, %s1093_s28), 0 }
  0x43   :  { %s1384_s28 = smov (!%p1094_p9, %s1382_s28), 49 }
  0x44   :  { %s212_s3 = scalar_lea.vmem %s1363_s1, %s1384_s28 }
  0x45   :  { %v229_v4 = vld [vmem:[%s212_s3] sm:$0x1] }
  0x46   :  { %230 = vst [vmem:[#allocation5 + $0x4] sm:$0x1] %v229_v4 }
  0x47   :  { %248 = vsyncadd [#allocation2 + $0x4], 16  ;;  %s1099_s4 = sld [smem:[#allocation4 + $0x5]] }
  0x4d   :  { %p255_p10 = scmp.gt.s32.totalorder %s1099_s4, 0  ;;  %p1100_p11 = scmp.lt.s32.totalorder %s1099_s4, 49 }
  0x4f   :  { %s1386_s4 = smov (!%p255_p10, %s1099_s4), 0 }
  0x50   :  { %s1388_s4 = smov (!%p1100_p11, %s1386_s4), 49 }
  0x51   :  { %s259_s7 = scalar_lea.vmem %s1363_s1, %s1388_s4 }
  0x52   :  { %v276_v5 = vld [vmem:[%s259_s7] sm:$0x1] }
  0x53   :  { %277 = vst [vmem:[#allocation5 + $0x5] sm:$0x1] %v276_v5 }
  0x54   :  { %295 = vsyncadd [#allocation2 + $0x5], 16  ;;  %s1105_s8 = sld [smem:[#allocation4 + $0x6]] }
  0x5a   :  { %p302_p12 = scmp.gt.s32.totalorder %s1105_s8, 0  ;;  %p1106_p13 = scmp.lt.s32.totalorder %s1105_s8, 49 }
  0x5c   :  { %s1390_s8 = smov (!%p302_p12, %s1105_s8), 0 }
  0x5d   :  { %s1392_s8 = smov (!%p1106_p13, %s1390_s8), 49 }
  0x5e   :  { %s306_s11 = scalar_lea.vmem %s1363_s1, %s1392_s8 }
  0x5f   :  { %v323_v6 = vld [vmem:[%s306_s11] sm:$0x1] }
  0x60   :  { %324 = vst [vmem:[#allocation5 + $0x6] sm:$0x1] %v323_v6 }
  0x61   :  { %342 = vsyncadd [#allocation2 + $0x6], 16  ;;  %s1111_s12 = sld [smem:[#allocation4 + $0x7]] }
  0x67   :  { %p349_p0 = scmp.gt.s32.totalorder %s1111_s12, 0  ;;  %p1112_p1 = scmp.lt.s32.totalorder %s1111_s12, 49 }
  0x69   :  { %s1394_s12 = smov (!%p349_p0, %s1111_s12), 0 }
  0x6a   :  { %s1396_s12 = smov (!%p1112_p1, %s1394_s12), 49 }
  0x6b   :  { %s353_s15 = scalar_lea.vmem %s1363_s1, %s1396_s12 }
  0x6c   :  { %v370_v7 = vld [vmem:[%s353_s15] sm:$0x1] }
  0x6d   :  { %371 = vst [vmem:[#allocation5 + $0x7] sm:$0x1] %v370_v7 }
  0x6e   :  { %389 = vsyncadd [#allocation2 + $0x7], 16  ;;  %s1117_s16 = sld [smem:[#allocation4 + $0x8]] }
  0x74   :  { %p396_p2 = scmp.gt.s32.totalorder %s1117_s16, 0  ;;  %p1118_p3 = scmp.lt.s32.totalorder %s1117_s16, 49 }
  0x76   :  { %s1398_s16 = smov (!%p396_p2, %s1117_s16), 0 }
  0x77   :  { %s1400_s16 = smov (!%p1118_p3, %s1398_s16), 49 }
  0x78   :  { %s400_s18 = scalar_lea.vmem %s1363_s1, %s1400_s16 }
  0x79   :  { %v417_v8 = vld [vmem:[%s400_s18] sm:$0x1] }
  0x7a   :  { %418 = vst [vmem:[#allocation5 + $0x8] sm:$0x1] %v417_v8 }
  0x7b   :  { %436 = vsyncadd [#allocation2 + $0x8], 16  ;;  %s1123_s19 = sld [smem:[#allocation4 + $0x9]] }
  0x81   :  { %p443_p4 = scmp.gt.s32.totalorder %s1123_s19, 0  ;;  %p1124_p5 = scmp.lt.s32.totalorder %s1123_s19, 49 }
  0x83   :  { %s1402_s19 = smov (!%p443_p4, %s1123_s19), 0 }
  0x84   :  { %s1404_s19 = smov (!%p1124_p5, %s1402_s19), 49 }
  0x85   :  { %s447_s22 = scalar_lea.vmem %s1363_s1, %s1404_s19 }
  0x86   :  { %v464_v9 = vld [vmem:[%s447_s22] sm:$0x1] }
  0x87   :  { %465 = vst [vmem:[#allocation5 + $0x9] sm:$0x1] %v464_v9 }
  0x88   :  { %483 = vsyncadd [#allocation2 + $0x9], 16  ;;  %s1129_s23 = sld [smem:[#allocation4 + $0xa]] }
  0x8e   :  { %p490_p6 = scmp.gt.s32.totalorder %s1129_s23, 0  ;;  %p1130_p7 = scmp.lt.s32.totalorder %s1129_s23, 49 }
  0x90   :  { %s1406_s23 = smov (!%p490_p6, %s1129_s23), 0 }
  0x91   :  { %s1408_s23 = smov (!%p1130_p7, %s1406_s23), 49 }
  0x92   :  { %s494_s26 = scalar_lea.vmem %s1363_s1, %s1408_s23 }
  0x93   :  { %v511_v10 = vld [vmem:[%s494_s26] sm:$0x1] }
  0x94   :  { %512 = vst [vmem:[#allocation5 + $0xa] sm:$0x1] %v511_v10 }
  0x95   :  { %530 = vsyncadd [#allocation2 + $0xa], 16  ;;  %s1135_s27 = sld [smem:[#allocation4 + $0xb]] }
  0x9b   :  { %p537_p8 = scmp.gt.s32.totalorder %s1135_s27, 0  ;;  %p1136_p9 = scmp.lt.s32.totalorder %s1135_s27, 49 }
  0x9d   :  { %s1410_s27 = smov (!%p537_p8, %s1135_s27), 0 }
  0x9e   :  { %s1412_s27 = smov (!%p1136_p9, %s1410_s27), 49 }
  0x9f   :  { %s541_s30 = scalar_lea.vmem %s1363_s1, %s1412_s27 }
  0xa0   :  { %v558_v11 = vld [vmem:[%s541_s30] sm:$0x1] }
  0xa1   :  { %559 = vst [vmem:[#allocation5 + $0xb] sm:$0x1] %v558_v11 }
  0xa2   :  { %577 = vsyncadd [#allocation2 + $0xb], 16  ;;  %s1141_s3 = sld [smem:[#allocation4 + $0xc]] }
  0xa8   :  { %p584_p10 = scmp.gt.s32.totalorder %s1141_s3, 0  ;;  %p1142_p11 = scmp.lt.s32.totalorder %s1141_s3, 49 }
  0xaa   :  { %s1414_s3 = smov (!%p584_p10, %s1141_s3), 0 }
  0xab   :  { %s1416_s3 = smov (!%p1142_p11, %s1414_s3), 49 }
  0xac   :  { %s588_s6 = scalar_lea.vmem %s1363_s1, %s1416_s3 }
  0xad   :  { %v605_v12 = vld [vmem:[%s588_s6] sm:$0x1] }
  0xae   :  { %606 = vst [vmem:[#allocation5 + $0xc] sm:$0x1] %v605_v12 }
  0xaf   :  { %624 = vsyncadd [#allocation2 + $0xc], 16  ;;  %s1147_s7 = sld [smem:[#allocation4 + $0xd]] }
  0xb5   :  { %p631_p12 = scmp.gt.s32.totalorder %s1147_s7, 0  ;;  %p1148_p13 = scmp.lt.s32.totalorder %s1147_s7, 49 }
  0xb7   :  { %s1418_s7 = smov (!%p631_p12, %s1147_s7), 0 }
  0xb8   :  { %s1420_s7 = smov (!%p1148_p13, %s1418_s7), 49 }
  0xb9   :  { %s635_s10 = scalar_lea.vmem %s1363_s1, %s1420_s7 }
  0xba   :  { %v652_v13 = vld [vmem:[%s635_s10] sm:$0x1] }
  0xbb   :  { %653 = vst [vmem:[#allocation5 + $0xd] sm:$0x1] %v652_v13 }
  0xbc   :  { %671 = vsyncadd [#allocation2 + $0xd], 16  ;;  %s1153_s11 = sld [smem:[#allocation4 + $0xe]] }
  0xc2   :  { %p678_p0 = scmp.gt.s32.totalorder %s1153_s11, 0  ;;  %p1154_p1 = scmp.lt.s32.totalorder %s1153_s11, 49 }
  0xc4   :  { %s1422_s11 = smov (!%p678_p0, %s1153_s11), 0 }
  0xc5   :  { %s1424_s11 = smov (!%p1154_p1, %s1422_s11), 49 }
  0xc6   :  { %s682_s14 = scalar_lea.vmem %s1363_s1, %s1424_s11 }
  0xc7   :  { %v699_v14 = vld [vmem:[%s682_s14] sm:$0x1] }
  0xc8   :  { %700 = vst [vmem:[#allocation5 + $0xe] sm:$0x1] %v699_v14 }
  0xc9   :  { %718 = vsyncadd [#allocation2 + $0xe], 16  ;;  %s1159_s15 = sld [smem:[#allocation4 + $0xf]] }
  0xcf   :  { %p725_p2 = scmp.gt.s32.totalorder %s1159_s15, 0  ;;  %p1160_p3 = scmp.lt.s32.totalorder %s1159_s15, 49 }
  0xd1   :  { %s1426_s15 = smov (!%p725_p2, %s1159_s15), 0 }
  0xd2   :  { %s1428_s15 = smov (!%p1160_p3, %s1426_s15), 49 }
  0xd3   :  { %s729_s17 = scalar_lea.vmem %s1363_s1, %s1428_s15 }
  0xd4   :  { %v746_v15 = vld [vmem:[%s729_s17] sm:$0x1] }
  0xd5   :  { %747 = vst [vmem:[#allocation5 + $0xf] sm:$0x1] %v746_v15 }
  0xd6   :  { %765 = vsyncadd [#allocation2 + $0xf], 16 }
  0xd7   :  { %1255 = dma.done.wait [#allocation2], 16 }
  0xd8   :  { %1256 = vsyncadd [#allocation2], 4294967280 }
  0xd9   :  { %1257 = dma.done.wait [#allocation2 + $0x1], 16 }
  0xda   :  { %1258 = vsyncadd [#allocation2 + $0x1], 4294967280 }
  0xdb   :  { %1259 = dma.done.wait [#allocation2 + $0x2], 16 }
  0xdc   :  { %1260 = vsyncadd [#allocation2 + $0x2], 4294967280 }
  0xdd   :  { %1261 = dma.done.wait [#allocation2 + $0x3], 16 }
  0xde   :  { %1262 = vsyncadd [#allocation2 + $0x3], 4294967280 }
  0xdf   :  { %1263 = dma.done.wait [#allocation2 + $0x4], 16 }
  0xe0   :  { %1264 = vsyncadd [#allocation2 + $0x4], 4294967280 }
  0xe1   :  { %1265 = dma.done.wait [#allocation2 + $0x5], 16 }
  0xe2   :  { %1266 = vsyncadd [#allocation2 + $0x5], 4294967280 }
  0xe3   :  { %1267 = dma.done.wait [#allocation2 + $0x6], 16 }
  0xe4   :  { %1268 = vsyncadd [#allocation2 + $0x6], 4294967280 }
  0xe5   :  { %1269 = dma.done.wait [#allocation2 + $0x7], 16 }
  0xe6   :  { %1270 = vsyncadd [#allocation2 + $0x7], 4294967280 }
  0xe7   :  { %1271 = dma.done.wait [#allocation2 + $0x8], 16 }
  0xe8   :  { %1272 = vsyncadd [#allocation2 + $0x8], 4294967280 }
  0xe9   :  { %1273 = dma.done.wait [#allocation2 + $0x9], 16 }
  0xea   :  { %1274 = vsyncadd [#allocation2 + $0x9], 4294967280 }
  0xeb   :  { %1275 = dma.done.wait [#allocation2 + $0xa], 16 }
  0xec   :  { %1276 = vsyncadd [#allocation2 + $0xa], 4294967280 }
  0xed   :  { %1277 = dma.done.wait [#allocation2 + $0xb], 16 }
  0xee   :  { %1278 = vsyncadd [#allocation2 + $0xb], 4294967280 }
  0xef   :  { %1279 = dma.done.wait [#allocation2 + $0xc], 16 }
  0xf0   :  { %1280 = vsyncadd [#allocation2 + $0xc], 4294967280 }
  0xf1   :  { %1281 = dma.done.wait [#allocation2 + $0xd], 16 }
  0xf2   :  { %1282 = vsyncadd [#allocation2 + $0xd], 4294967280 }
  0xf3   :  { %1283 = dma.done.wait [#allocation2 + $0xe], 16 }
  0xf4   :  { %1284 = vsyncadd [#allocation2 + $0xe], 4294967280 }
  0xf5   :  { %1285 = dma.done.wait [#allocation2 + $0xf], 16 }
  0xf6   :  { %1286 = vsyncadd [#allocation2 + $0xf], 4294967280  ;;  %s867_s19 = sshll.u32 %s1364_s2, 4  ;;  %s1290_s20 = smov [#allocation5]   ;;  %s868_s19 = int_to_ptr.hbm [resolvable:$true] %s867_s19 }
  0xf7   :  { %s865_s21 = sshll.u32 %s1290_s20, 4  ;;  %s1291_s22 = smov 128   ;;  %s866_s21 = int_to_ptr.vmem [resolvable:$true] %s865_s21 }
  0xf8   :  { %s1292_s23 = smov 8  }
  0xf9   :  { %873 = dma.vmem_to_hbm [thread:$0]  %s866_s21, 256, %s868_s19, [#allocation6], %s1291_s22, %s1291_s22, %s1292_s23  }
  0xfa   :  { %1287 = dma.done.wait [#allocation6], 256  }
  0xfb   :  { %1288 = vsyncadd [#allocation6], 4294967040 }
  0xfc   :  { %878 = vsyncpa [#allocation6], 1 }
  0xfd   :  { %879 = vsyncmov [#allocation2] }
 0x100   :  { %s880_s24 = vpop.sfrf %879 }
 0x101   :  { %p1165_p4 = scmp.ne.s32.totalorder %s880_s24, 0 }
 0x103   :  { %884 = shalt.err (%p1165_p4)  }
 0x104   :  { %886 = vsyncmov [#allocation2 + $0x1] }
 0x107   :  { %s887_s25 = vpop.sfrf %886 }
 0x108   :  { %p1166_p5 = scmp.ne.s32.totalorder %s887_s25, 0 }
 0x10a   :  { %891 = shalt.err (%p1166_p5)  }
 0x10b   :  { %893 = vsyncmov [#allocation2 + $0x2] }
 0x10e   :  { %s894_s2 = vpop.sfrf %893 }
 0x10f   :  { %p1167_p6 = scmp.ne.s32.totalorder %s894_s2, 0 }
 0x111   :  { %898 = shalt.err (%p1167_p6)  }
 0x112   :  { %900 = vsyncmov [#allocation2 + $0x3] }
 0x115   :  { %s901_s26 = vpop.sfrf %900 }
 0x116   :  { %p1168_p7 = scmp.ne.s32.totalorder %s901_s26, 0 }
 0x118   :  { %905 = shalt.err (%p1168_p7)  }
 0x119   :  { %907 = vsyncmov [#allocation2 + $0x4] }
 0x11c   :  { %s908_s27 = vpop.sfrf %907 }
 0x11d   :  { %p1169_p8 = scmp.ne.s32.totalorder %s908_s27, 0 }
 0x11f   :  { %912 = shalt.err (%p1169_p8)  }
 0x120   :  { %914 = vsyncmov [#allocation2 + $0x5] }
 0x123   :  { %s915_s28 = vpop.sfrf %914 }
 0x124   :  { %p1170_p9 = scmp.ne.s32.totalorder %s915_s28, 0 }
 0x126   :  { %919 = shalt.err (%p1170_p9)  }
 0x127   :  { %921 = vsyncmov [#allocation2 + $0x6] }
 0x12a   :  { %s922_s29 = vpop.sfrf %921 }
 0x12b   :  { %p1171_p10 = scmp.ne.s32.totalorder %s922_s29, 0 }
 0x12d   :  { %926 = shalt.err (%p1171_p10)  }
 0x12e   :  { %928 = vsyncmov [#allocation2 + $0x7] }
 0x131   :  { %s929_s30 = vpop.sfrf %928 }
 0x132   :  { %p1172_p11 = scmp.ne.s32.totalorder %s929_s30, 0 }
 0x134   :  { %933 = shalt.err (%p1172_p11)  }
 0x135   :  { %935 = vsyncmov [#allocation2 + $0x8] }
 0x138   :  { %s936_s3 = vpop.sfrf %935 }
 0x139   :  { %p1173_p12 = scmp.ne.s32.totalorder %s936_s3, 0 }
 0x13b   :  { %940 = shalt.err (%p1173_p12)  }
 0x13c   :  { %942 = vsyncmov [#allocation2 + $0x9] }
 0x13f   :  { %s943_s4 = vpop.sfrf %942 }
 0x140   :  { %p1174_p13 = scmp.ne.s32.totalorder %s943_s4, 0 }
 0x142   :  { %947 = shalt.err (%p1174_p13)  }
 0x143   :  { %949 = vsyncmov [#allocation2 + $0xa] }
 0x146   :  { %s950_s5 = vpop.sfrf %949 }
 0x147   :  { %p1175_p0 = scmp.ne.s32.totalorder %s950_s5, 0 }
 0x149   :  { %954 = shalt.err (%p1175_p0)  }
 0x14a   :  { %956 = vsyncmov [#allocation2 + $0xb] }
 0x14d   :  { %s957_s6 = vpop.sfrf %956 }
 0x14e   :  { %p1176_p1 = scmp.ne.s32.totalorder %s957_s6, 0 }
 0x150   :  { %961 = shalt.err (%p1176_p1)  }
 0x151   :  { %963 = vsyncmov [#allocation2 + $0xc] }
 0x154   :  { %s964_s7 = vpop.sfrf %963 }
 0x155   :  { %p1177_p2 = scmp.ne.s32.totalorder %s964_s7, 0 }
 0x157   :  { %968 = shalt.err (%p1177_p2)  }
 0x158   :  { %970 = vsyncmov [#allocation2 + $0xd] }
 0x15b   :  { %s971_s8 = vpop.sfrf %970 }
 0x15c   :  { %p1178_p3 = scmp.ne.s32.totalorder %s971_s8, 0 }
 0x15e   :  { %975 = shalt.err (%p1178_p3)  }
 0x15f   :  { %977 = vsyncmov [#allocation2 + $0xe] }
 0x162   :  { %s978_s9 = vpop.sfrf %977 }
 0x163   :  { %p1179_p4 = scmp.ne.s32.totalorder %s978_s9, 0 }
 0x165   :  { %982 = shalt.err (%p1179_p4)  }
 0x166   :  { %984 = vsyncmov [#allocation2 + $0xf] }
 0x169   :  { %s985_s10 = vpop.sfrf %984 }
 0x16a   :  { %p1180_p5 = scmp.ne.s32.totalorder %s985_s10, 0 }
 0x16c   :  { %989 = shalt.err (%p1180_p5)  }

</bundles_post_ra>
